<compile_context>
chip_gen: v5e
topology: v5e:2x2
jax: 0.10.0
libtpu: 0.0.40
codegen_flags: <defaults>
</compile_context>

<pallas_src>
import functools

import jax
import jax.numpy as jnp
import numpy as np
from jax.experimental import pallas as pl
from jax.experimental.pallas import tpu as pltpu


_MN_CAPS = (2048, 1024, 512, 256, 128)   # candidate M/N tile sizes, largest first
_TK_CAPS = (2048, 1024, 512, 256, 128)   # candidate K tile sizes (K-tiled path)


def _round_up(x, m):
    return ((x + m - 1) // m) * m


def _dedup(seq):
    return list(dict.fromkeys(seq))


def _vmem_capacity_bytes():
    """Per-core VMEM capacity; conservative 64 MiB (v7x-sized) fallback."""
    try:
        cap = int(pltpu.get_tpu_info().vmem_capacity_bytes)
        if cap > 0:
            return cap
    except Exception:
        pass
    return 64 << 20


def _tile_budget_bytes():
    # ~70% of physical VMEM for the double-buffered tile working set:
    #   v5e/v6e (128 MiB) -> 88 MiB, v7x (64 MiB) -> ~45 MiB.
    return min(int(_vmem_capacity_bytes() * 0.70), 88 << 20)


def _footprint(tm, tn, tk, x_b, w_b, o_b, k_tiled):
    # Double-buffered X / W^T / bias / out tiles (+ persistent f32 accumulator).
    f = 2 * (tm * tk * x_b + tk * tn * w_b + 8 * tn * 4 + tm * tn * o_b)
    if k_tiled:
        f += tm * tn * 4
    return f


def _best_mn(tm_cands, tn_cands, tk, x_b, w_b, o_b, k_tiled, budget):
    best = None
    for tn in tn_cands:
        for tm in tm_cands:
            if _footprint(tm, tn, tk, x_b, w_b, o_b, k_tiled) <= budget:
                if best is None or tm * tn > best[0] * best[1]:
                    best = (tm, tn)
    return best


def _plan_k(F, C, use_bf16, budget):
    """Batch-independent K strategy, shared by prepare_params and the apply path."""
    x_b = o_b = 4                        # conservative: f32 activations / f32 output
    w_b = 2 if use_bf16 else 4
    C_pad = _round_up(C, 128)
    F128 = _round_up(F, 128)
    tn_cands = _dedup([min(c, C_pad) for c in _MN_CAPS])
    tm_cands = list(_MN_CAPS)

    # 1) Single-K fast path: whole feature dim in one tile -> no K grid axis, no
    #    accumulator read-modify-write, no pl.when.
    if _best_mn(tm_cands, tn_cands, F128, x_b, w_b, o_b, False, budget):
        return dict(single_k=True, tk=F128, F_pad=F128, C_pad=C_pad)

    # 2) K-tiled: largest tk that fits, so the per-step (tm, tn) f32 accumulator RMW
    #    is amortised over more MXU work (most important on v5e's single vst slot).
    for tk in _TK_CAPS:
        if tk >= F128:
            continue
        if _best_mn(tm_cands, tn_cands, tk, x_b, w_b, o_b, True, budget):
            return dict(single_k=False, tk=tk, F_pad=_round_up(F, tk), C_pad=C_pad)
    raise ValueError("no VMEM-feasible tile configuration (tile budget too small)")


def _tm_candidates(B):
    if B < 8:
        return [B]                       # block dim == full array dim is allowed
    b8 = (B // 8) * 8
    return _dedup([min(c, b8) for c in _MN_CAPS])


def _pick_mn(B, C_pad, tk, k_tiled, x_b, w_b, o_b, budget):
    tm_cands = _tm_candidates(B)
    tn_cands = _dedup([min(c, C_pad) for c in _MN_CAPS])
    mn = _best_mn(tm_cands, tn_cands, tk, x_b, w_b, o_b, k_tiled, budget)
    if mn is None:                       # defensive; the plan already guaranteed a fit
        mn = (tm_cands[-1], tn_cands[-1])
    return mn


# --------------------------------------------------------------------------- kernels
def _logreg_kernel_single_k(x_ref, wt_ref, b_ref, o_ref, *, compute_dtype):
    # x_ref: (tm, F_pad), wt_ref: (F_pad, tn), b_ref: (1, tn), o_ref: (tm, tn)
    x = x_ref[...].astype(compute_dtype)          # in-kernel cast (cheap VPU, co-issues)
    acc = jnp.dot(x, wt_ref[...], preferred_element_type=jnp.float32)
    o_ref[...] = jax.nn.sigmoid(acc + b_ref[...]).astype(o_ref.dtype)


def _logreg_kernel_k_tiled(x_ref, wt_ref, b_ref, o_ref, acc_ref, *, compute_dtype):
    # Grid axis 2 is the ("arbitrary") K reduction; acc_ref persists across it.
    k = pl.program_id(2)
    x = x_ref[...].astype(compute_dtype)
    part = jnp.dot(x, wt_ref[...], preferred_element_type=jnp.float32)

    @pl.when(k == 0)
    def _():
        acc_ref[...] = part                       # direct write: no zero-fill + add

    @pl.when(k > 0)
    def _():
        acc_ref[...] += part

    @pl.when(k == pl.num_programs(2) - 1)
    def _():
        o_ref[...] = jax.nn.sigmoid(acc_ref[...] + b_ref[...]).astype(o_ref.dtype)


# --------------------------------------------------------------------------- wrappers
def prepare_params(weight, bias, *, use_bf16=True, vmem_tile_budget_bytes=None):
    """Transpose + pad the nn.Linear parameters ONCE (outside the per-call hot path).

    weight: (nb_classes, fts_dim) PyTorch layout; bias: (nb_classes,)
    Returns wt_pad: (F_pad, C_pad) [bf16 if use_bf16 else f32], bias_pad: (1, C_pad) f32.
    """
    weight = jnp.asarray(weight)
    bias = jnp.asarray(bias)
    C, F = weight.shape
    budget = vmem_tile_budget_bytes or _tile_budget_bytes()
    plan = _plan_k(F, C, use_bf16, budget)
    F_pad, C_pad = plan["F_pad"], plan["C_pad"]

    w_dtype = jnp.bfloat16 if use_bf16 else jnp.float32
    wt = weight.T.astype(w_dtype)                              # (F, C)
    if (F_pad, C_pad) != (F, C):
        wt = jnp.zeros((F_pad, C_pad), w_dtype).at[:F, :C].set(wt)
    bias_pad = jnp.zeros((1, C_pad), jnp.float32).at[0, :C].set(bias.astype(jnp.float32))
    return wt, bias_pad


@functools.partial(
    jax.jit,
    static_argnames=("nb_classes", "use_bf16", "out_dtype", "vmem_tile_budget_bytes"),
)
def multilabel_logreg_apply(fts, wt_pad, bias_pad, *, nb_classes, use_bf16=True,
                            out_dtype=None, vmem_tile_budget_bytes=None):
    """sigmoid(fts @ W^T + b) with pre-prepared (transposed, padded) parameters."""
    B, F = fts.shape
    budget = vmem_tile_budget_bytes or _tile_budget_bytes()
    plan = _plan_k(F, nb_classes, use_bf16, budget)
    single_k, tk = plan["single_k"], plan["tk"]
    F_pad, C_pad = plan["F_pad"], plan["C_pad"]

    expected_w_dtype = np.dtype(jnp.bfloat16 if use_bf16 else jnp.float32)
    if wt_pad.shape != (F_pad, C_pad) or wt_pad.dtype != expected_w_dtype:
        raise ValueError(
            f"wt_pad {wt_pad.shape}/{wt_pad.dtype} does not match plan "
            f"{(F_pad, C_pad)}/{expected_w_dtype}; re-run prepare_params with the same "
            f"use_bf16 / vmem_tile_budget_bytes.")
    if bias_pad.shape != (1, C_pad):
        raise ValueError(f"bias_pad has shape {bias_pad.shape}, expected {(1, C_pad)}")

    out_dtype = fts.dtype if out_dtype is None else np.dtype(out_dtype)
    compute_dtype = jnp.bfloat16 if use_bf16 else jnp.float32

    # Batch dim is never padded (ragged M handled by cdiv grid + masked stores).
    # Only pad the feature dim when it is ragged w.r.t. the chosen K tile.
    x = fts if F_pad == F else jnp.pad(fts, ((0, 0), (0, F_pad - F)))

    x_b = x.dtype.itemsize
    w_b = wt_pad.dtype.itemsize
    o_b = np.dtype(out_dtype).itemsize
    tm, tn = _pick_mn(B, C_pad, tk, not single_k, x_b, w_b, o_b, budget)

    grid_m, grid_n = pl.cdiv(B, tm), pl.cdiv(C_pad, tn)
    # Megacore (v7x has 2 TensorCores): ensure the parallel grid portion has >= 2 steps.
    if grid_m * grid_n == 1:
        if tn >= 256:
            tn //= 2
        elif tm >= 16:
            tm = _round_up(tm // 2, 8)
        grid_m, grid_n = pl.cdiv(B, tm), pl.cdiv(C_pad, tn)

    needed = _footprint(tm, tn, tk, x_b, w_b, o_b, not single_k)
    cap = _vmem_capacity_bytes()
    hard_cap = max(32 << 20, min(cap - (12 << 20), 100 << 20))   # headroom on v7x
    vmem_limit = int(min(hard_cap, max(32 << 20, needed + (8 << 20))))

    cost = pl.CostEstimate(
        flops=2 * B * F_pad * C_pad,
        transcendentals=B * C_pad,
        # X is re-streamed once per N tile, W once per M tile.
        bytes_accessed=(grid_n * B * F_pad * x_b
                        + grid_m * F_pad * C_pad * w_b
                        + B * C_pad * o_b),
    )

    if single_k:
        kernel = functools.partial(_logreg_kernel_single_k, compute_dtype=compute_dtype)
        grid = (grid_m, grid_n)
        in_specs = [
            pl.BlockSpec((tm, F_pad), lambda i, j: (i, 0)),     # X tile (full K)
            pl.BlockSpec((F_pad, tn), lambda i, j: (0, j)),     # W^T tile (full K)
            pl.BlockSpec((1, tn), lambda i, j: (0, j)),         # bias tile
        ]
        out_specs = pl.BlockSpec((tm, tn), lambda i, j: (i, j))
        scratch = ()
        dims = ("parallel", "parallel")
    else:
        kernel = functools.partial(_logreg_kernel_k_tiled, compute_dtype=compute_dtype)
        grid = (grid_m, grid_n, F_pad // tk)
        in_specs = [
            pl.BlockSpec((tm, tk), lambda i, j, k: (i, k)),     # X tile
            pl.BlockSpec((tk, tn), lambda i, j, k: (k, j)),     # W^T tile
            pl.BlockSpec((1, tn), lambda i, j, k: (0, j)),      # bias tile
        ]
        out_specs = pl.BlockSpec((tm, tn), lambda i, j, k: (i, j))
        scratch = (pltpu.VMEM((tm, tn), jnp.float32),)
        dims = ("parallel", "parallel", "arbitrary")

    out = pl.pallas_call(
        kernel,
        out_shape=jax.ShapeDtypeStruct((B, C_pad), out_dtype),
        grid_spec=pltpu.PrefetchScalarGridSpec(
            num_scalar_prefetch=0,
            grid=grid,
            in_specs=in_specs,
            out_specs=out_specs,
            scratch_shapes=scratch,
        ),
        compiler_params=pltpu.CompilerParams(
            dimension_semantics=dims,
            vmem_limit_bytes=vmem_limit,
        ),
        cost_estimate=cost,
    )(x, wt_pad, bias_pad)

    # Skip the slice entirely when no class padding was added.
    return out if C_pad == nb_classes else out[:, :nb_classes]


def multilabel_logreg(fts, weight, bias, *, use_bf16=True, out_dtype=None,
                      vmem_tile_budget_bytes=None):
    """One-shot convenience wrapper (prepares params per call).

    For repeated calls (training / serving), call prepare_params() once and reuse
    multilabel_logreg_apply() so the weight transpose/pad is not redone per step.
    """
    nb_classes = weight.shape[0]
    wt_pad, bias_pad = prepare_params(
        weight, bias, use_bf16=use_bf16, vmem_tile_budget_bytes=vmem_tile_budget_bytes)
    return multilabel_logreg_apply(
        fts, wt_pad, bias_pad, nb_classes=nb_classes, use_bf16=use_bf16,
        out_dtype=out_dtype, vmem_tile_budget_bytes=vmem_tile_budget_bytes)


if __name__ == "__main__":
    key = jax.random.PRNGKey(0)
    kx, kw, kb, kx2, kw2, kb2 = jax.random.split(key, 6)

    # --- Case 1: ragged small shapes, strict-f32 path (single-K-tile kernel). ---
    B, F, C = 272, 160, 200
    fts = jax.random.normal(kx, (B, F), dtype=jnp.float32)
    bound = 1.0 / (F ** 0.5)
    weight = jax.random.uniform(kw, (C, F), minval=-bound, maxval=bound, dtype=jnp.float32)
    bias = jax.random.uniform(kb, (C,), minval=-bound, maxval=bound, dtype=jnp.float32)
    ref = jax.nn.sigmoid(fts @ weight.T + bias)

    out_f32 = jax.block_until_ready(multilabel_logreg(fts, weight, bias, use_bf16=False))
    assert out_f32.shape == (B, C)
    assert jnp.allclose(out_f32, ref, atol=2e-5, rtol=2e-5)

    # --- Case 2: same shapes, default bf16-MXU fast path (f32 accumulation). ---
    out_bf16 = jax.block_until_ready(multilabel_logreg(fts, weight, bias))
    assert out_bf16.shape == (B, C)
    assert jnp.allclose(out_bf16, ref, atol=3e-2, rtol=3e-2)

    # --- Case 3: force the K-tiled accumulator kernel with a tiny tile budget. ---
    B2, F2, C2 = 256, 1024, 380
    fts2 = jax.random.normal(kx2, (B2, F2), dtype=jnp.float32)
    bound2 = 1.0 / (F2 ** 0.5)
    weight2 = jax.random.uniform(kw2, (C2, F2), minval=-bound2, maxval=bound2,
                                 dtype=jnp.float32)
    bias2 = jax.random.uniform(kb2, (C2,), minval=-bound2, maxval=bound2, dtype=jnp.float32)
    ref2 = jax.nn.sigmoid(fts2 @ weight2.T + bias2)

    out_k = jax.block_until_ready(
        multilabel_logreg(fts2, weight2, bias2, vmem_tile_budget_bytes=1 << 20))
    assert out_k.shape == (B2, C2)
    assert jnp.allclose(out_k, ref2, atol=3e-2, rtol=3e-2)

    print("KERNEL_OK")
</pallas_src>

<mosaic_0001>
module attributes {stable_mosaic.version = 11 : i64} {
  func.func @_logreg_kernel_single_k(%arg0: i32, %arg1: i32, %arg2: memref<272x256xf32, #tpu.memory_space<vmem>>, %arg3: memref<256x128xf32, #tpu.memory_space<vmem>>, %arg4: memref<1x128xf32, #tpu.memory_space<vmem>>, %arg5: memref<272x128xf32, #tpu.memory_space<vmem>>) attributes {dimension_semantics = [#tpu.dimension_semantics<parallel>, #tpu.dimension_semantics<parallel>], iteration_bounds = array<i64: 1, 2>, scalar_prefetch = 0 : i64, scratch_operands = 0 : i64, tpu.core_type = #tpu.core_type<tc>, window_params = [{transform_indices = @transform_0, window_bounds = array<i64: 272, 256>}, {transform_indices = @transform_1, window_bounds = array<i64: 256, 128>}, {transform_indices = @transform_2, window_bounds = array<i64: 1, 128>}, {transform_indices = @transform_3, window_bounds = array<i64: 272, 128>}]} {
    %c0 = arith.constant 0 : index
    %c0_0 = arith.constant 0 : index
    %0 = vector.load %arg2[%c0, %c0_0] : memref<272x256xf32, #tpu.memory_space<vmem>>, vector<272x256xf32>
    %c0_1 = arith.constant 0 : index
    %c0_2 = arith.constant 0 : index
    %1 = vector.load %arg3[%c0_1, %c0_2] : memref<256x128xf32, #tpu.memory_space<vmem>>, vector<256x128xf32>
    %cst = arith.constant dense<0.000000e+00> : vector<272x128xf32>
    %2 = tpu.matmul %0, %1, %cst {dimension_numbers = #tpu.dot_dimension_numbers<[1], [0], [0], [1], [0, 0, 1, 1], [], []>} : vector<272x256xf32>, vector<256x128xf32>, vector<272x128xf32> -> vector<272x128xf32>
    %c0_3 = arith.constant 0 : index
    %c0_4 = arith.constant 0 : index
    %3 = vector.load %arg4[%c0_3, %c0_4] : memref<1x128xf32, #tpu.memory_space<vmem>>, vector<1x128xf32>
    %4 = vector.broadcast %3 : vector<1x128xf32> to vector<272x128xf32>
    %5 = arith.addf %2, %4 : vector<272x128xf32>
    %6 = arith.negf %5 : vector<272x128xf32>
    %7 = math.exp %6 : vector<272x128xf32>
    %cst_5 = arith.constant 1.000000e+00 : f32
    %8 = vector.broadcast %cst_5 : f32 to vector<272x128xf32>
    %9 = arith.addf %8, %7 : vector<272x128xf32>
    %10 = arith.divf %8, %9 : vector<272x128xf32>
    %c0_6 = arith.constant 0 : index
    %c0_7 = arith.constant 0 : index
    %11 = vector.load %arg5[%c0_6, %c0_7] : memref<272x128xf32, #tpu.memory_space<vmem>>, vector<272x128xf32>
    tpu.vector_store %arg5[%c0_6, %c0_7], %10 {strides = array<i32>} : memref<272x128xf32, #tpu.memory_space<vmem>>, vector<272x128xf32>,
    return
  }
  func.func @transform_0(%arg0: i32, %arg1: i32) -> (i32, i32) {
    %c0_i32 = arith.constant 0 : i32
    %c0_i32_0 = arith.constant 0 : i32
    return %arg0, %c0_i32 : i32, i32
  }
  func.func @transform_1(%arg0: i32, %arg1: i32) -> (i32, i32) {
    %c0_i32 = arith.constant 0 : i32
    %c0_i32_0 = arith.constant 0 : i32
    return %c0_i32, %arg1 : i32, i32
  }
  func.func @transform_2(%arg0: i32, %arg1: i32) -> (i32, i32) {
    %c0_i32 = arith.constant 0 : i32
    %c0_i32_0 = arith.constant 0 : i32
    return %c0_i32, %arg1 : i32, i32
  }
  func.func @transform_3(%arg0: i32, %arg1: i32) -> (i32, i32) {
    %c0_i32 = arith.constant 0 : i32
    return %arg0, %arg1 : i32, i32
  }
}

</mosaic_0001>

<bundles_post_ra>
// kernel: multilabel_logreg_apply.1
= control target key start
LH: loop header
LB: loop body
LE: loop exit
PB: predicated region body
PF: predicated region fallthrough
CT: control target
= control target key end

     0   :  { %8 = vsyncpa [#allocation4], 0  ;;  %s2853_s0 = inlined_call_operand.vmem [shape: f32[272,256], index: 0, kind: input, shape index: {}]   ;;  %s2854_s1 = inlined_call_operand.vmem [shape: f32[256,256], index: 1, kind: input, shape index: {}]   ;;  %s2855_s2 = inlined_call_operand.vmem [shape: f32[1,256], index: 2, kind: input, shape index: {}]   ;;  %s2856_s3 = inlined_call_operand.hbm [shape: f32[272,256], index: 3, kind: output, shape index: {}]  }
   0x1   :  { %10 = vsyncpa [#allocation4 + $0x1], 0  ;;  %s1902_s12 = smov 0   ;;  %s1904_s13 = smov 0  }
   0x2   :  { %s1906_s14 = smov 0   ;;  %s1908_s15 = smov 0  }
   0x3   :  { %s1910_s16 = smov 0   ;;  %s1912_s17 = smov 0  }
   0x4 LB: > { %s1524_s18 = sadd.s32 4294967295, %s1877_s17   ;;  %s1525_s19 = sadd.s32 4294967294, %s1877_s17   ;;  %s1877_s17 = sphi %s1912_s17, %s16_s17   ;;  %s1873_s16 = sphi %s1910_s16, %s2911_s16   ;;  %s1869_s15 = sphi %s1908_s15, %s2910_s15   ;;  %s1865_s14 = sphi %s1906_s14, %s2909_s14   ;;  %s1861_s13 = sphi %s1904_s13, %s2908_s13   ;;  %s1857_s12 = sphi %s1902_s12, %s2907_s12  }
   0x5   : > { %s25_s20 = sadd.s32 1, %s1873_s16  ;;  %s61_s21 = sadd.s32 1, %s1865_s14 }
   0x6   : > { %p26_p0 = scmp.ge.s32.totalorder %s25_s20, 2  ;;  %p68_p1 = scmp.ne.s32.totalorder %s1865_s14, %s1861_s13 }
   0x7   : > { %p69_p2 = scmp.eq.s32.totalorder %s1877_s17, 0  ;;  %p126_p3 = scmp.eq.s32.totalorder %s1524_s18, 1 }
   0x8   : > { %s2913_s20 = smov (%p26_p0, %s25_s20), 0  ;;  %p131_p6 = scmp.ne.s32.totalorder %s1861_s13, %s1857_s12 }
   0x9   : > { %p70_p4 = por %p69_p2, %p68_p1  ;;  %p1941_p5 = por %p126_p3, %p68_p1 }
   0xa   : > { %s58_s23 = ssub.s32 %s1873_s16, %s2913_s20  ;;  %p132_p8 = scmp.eq.s32.totalorder %s1525_s19, 1 }
   0xb   : > { %p59_p7 = scmp.eq.s32.totalorder %s58_s23, 0  ;;  %p1528_p10 = scmp.ge.s32.totalorder %s1877_s17, 2 }
   0xc   : > { %p1952_p9 = por %p132_p8, %p131_p6 }
   0xd   : > { %s1950_s24 = scalar_select %p59_p7, %s1865_s14, %s61_s21  }
   0xe   : > { %158 = sbr.rel (%p1528_p10) target bundleno = 55 (0x37), region = 20 }
  0x13   : > { %161 = sbr.rel (!%p70_p4) target bundleno = 55 (0x37), region = 24  ;;  %s163_s26 = sand.u32 (%p70_p4), 1, %s1865_s14  }
  0x14   : > { %s1530_s27 = sshll.u32 (%p70_p4), %s1873_s16, 3  ;;  %s1529_s28 = sshll.u32 (%p70_p4), %s163_s26, 8 }
  0x15   : > { %s1964_s4 = scalar_lea.vmem (%p70_p4), %s2854_s1, %s1530_s27  ;;  %s1969_s5 = scalar_lea.vmem (%p70_p4), [#allocation2], %s1529_s28 }
  0x16   : > { %v258_v0 = vld [vmem:[%s1964_s4] sm:$0xff] (%p70_p4)  ;;  %v260_v1 = vld [vmem:[%s1964_s4 + $0x10] sm:$0xff] (%p70_p4) }
  0x17   : > { %v262_v2 = vld [vmem:[%s1964_s4 + $0x20] sm:$0xff] (%p70_p4)  ;;  %259 = vst [vmem:[%s1969_s5] sm:$0xff] (%p70_p4), %v258_v0  ;;  %v264_v3 = vld [vmem:[%s1964_s4 + $0x30] sm:$0xff] (%p70_p4) }
  0x18   : > { %261 = vst [vmem:[%s1969_s5 + $0x8] sm:$0xff] %v260_v1  ;;  %v266_v4 = vld [vmem:[%s1964_s4 + $0x40] sm:$0xff]  ;;  %v268_v5 = vld [vmem:[%s1964_s4 + $0x50] sm:$0xff] }
  0x19   : > { %263 = vst [vmem:[%s1969_s5 + $0x10] sm:$0xff] %v262_v2  ;;  %v270_v6 = vld [vmem:[%s1964_s4 + $0x60] sm:$0xff]  ;;  %v272_v7 = vld [vmem:[%s1964_s4 + $0x70] sm:$0xff] }
  0x1a   : > { %265 = vst [vmem:[%s1969_s5 + $0x18] sm:$0xff] %v264_v3  ;;  %v274_v8 = vld [vmem:[%s1964_s4 + $0x80] sm:$0xff]  ;;  %v276_v9 = vld [vmem:[%s1964_s4 + $0x90] sm:$0xff] }
  0x1b   : > { %267 = vst [vmem:[%s1969_s5 + $0x20] sm:$0xff] %v266_v4  ;;  %v278_v10 = vld [vmem:[%s1964_s4 + $0xa0] sm:$0xff]  ;;  %v280_v11 = vld [vmem:[%s1964_s4 + $0xb0] sm:$0xff] }
  0x1c   : > { %269 = vst [vmem:[%s1969_s5 + $0x28] sm:$0xff] %v268_v5  ;;  %v282_v12 = vld [vmem:[%s1964_s4 + $0xc0] sm:$0xff]  ;;  %v284_v13 = vld [vmem:[%s1964_s4 + $0xd0] sm:$0xff] }
  0x1d   : > { %271 = vst [vmem:[%s1969_s5 + $0x30] sm:$0xff] %v270_v6  ;;  %v286_v14 = vld [vmem:[%s1964_s4 + $0xe0] sm:$0xff]  ;;  %v288_v15 = vld [vmem:[%s1964_s4 + $0xf0] sm:$0xff] }
  0x1e   : > { %273 = vst [vmem:[%s1969_s5 + $0x38] sm:$0xff] %v272_v7  ;;  %v290_v16 = vld [vmem:[%s1964_s4 + $0x100] sm:$0xff]  ;;  %v292_v17 = vld [vmem:[%s1964_s4 + $0x110] sm:$0xff] }
  0x1f   : > { %275 = vst [vmem:[%s1969_s5 + $0x40] sm:$0xff] %v274_v8  ;;  %v294_v18 = vld [vmem:[%s1964_s4 + $0x120] sm:$0xff]  ;;  %v296_v19 = vld [vmem:[%s1964_s4 + $0x130] sm:$0xff] }
  0x20   : > { %277 = vst [vmem:[%s1969_s5 + $0x48] sm:$0xff] %v276_v9  ;;  %v298_v20 = vld [vmem:[%s1964_s4 + $0x140] sm:$0xff]  ;;  %v300_v21 = vld [vmem:[%s1964_s4 + $0x150] sm:$0xff] }
  0x21   : > { %279 = vst [vmem:[%s1969_s5 + $0x50] sm:$0xff] %v278_v10  ;;  %v302_v22 = vld [vmem:[%s1964_s4 + $0x160] sm:$0xff]  ;;  %v304_v23 = vld [vmem:[%s1964_s4 + $0x170] sm:$0xff] }
  0x22   : > { %281 = vst [vmem:[%s1969_s5 + $0x58] sm:$0xff] %v280_v11  ;;  %v306_v24 = vld [vmem:[%s1964_s4 + $0x180] sm:$0xff]  ;;  %v308_v25 = vld [vmem:[%s1964_s4 + $0x190] sm:$0xff] }
  0x23   : > { %283 = vst [vmem:[%s1969_s5 + $0x60] sm:$0xff] %v282_v12  ;;  %v310_v26 = vld [vmem:[%s1964_s4 + $0x1a0] sm:$0xff]  ;;  %v312_v27 = vld [vmem:[%s1964_s4 + $0x1b0] sm:$0xff] }
  0x24   : > { %285 = vst [vmem:[%s1969_s5 + $0x68] sm:$0xff] %v284_v13  ;;  %v314_v28 = vld [vmem:[%s1964_s4 + $0x1c0] sm:$0xff]  ;;  %v316_v29 = vld [vmem:[%s1964_s4 + $0x1d0] sm:$0xff] }
  0x25   : > { %287 = vst [vmem:[%s1969_s5 + $0x70] sm:$0xff] %v286_v14  ;;  %v318_v30 = vld [vmem:[%s1964_s4 + $0x1e0] sm:$0xff]  ;;  %v320_v31 = vld [vmem:[%s1964_s4 + $0x1f0] sm:$0xff] }
  0x26   : > { %289 = vst [vmem:[%s1969_s5 + $0x78] sm:$0xff] %v288_v15 }
  0x27   : > { %291 = vst [vmem:[%s1969_s5 + $0x80] sm:$0xff] %v290_v16 }
  0x28   : > { %293 = vst [vmem:[%s1969_s5 + $0x88] sm:$0xff] %v292_v17 }
  0x29   : > { %295 = vst [vmem:[%s1969_s5 + $0x90] sm:$0xff] %v294_v18 }
  0x2a   : > { %297 = vst [vmem:[%s1969_s5 + $0x98] sm:$0xff] %v296_v19 }
  0x2b   : > { %299 = vst [vmem:[%s1969_s5 + $0xa0] sm:$0xff] %v298_v20 }
  0x2c   : > { %301 = vst [vmem:[%s1969_s5 + $0xa8] sm:$0xff] %v300_v21 }
  0x2d   : > { %303 = vst [vmem:[%s1969_s5 + $0xb0] sm:$0xff] %v302_v22 }
  0x2e   : > { %305 = vst [vmem:[%s1969_s5 + $0xb8] sm:$0xff] %v304_v23 }
  0x2f   : > { %307 = vst [vmem:[%s1969_s5 + $0xc0] sm:$0xff] %v306_v24 }
  0x30   : > { %309 = vst [vmem:[%s1969_s5 + $0xc8] sm:$0xff] %v308_v25 }
  0x31   : > { %311 = vst [vmem:[%s1969_s5 + $0xd0] sm:$0xff] %v310_v26 }
  0x32   : > { %313 = vst [vmem:[%s1969_s5 + $0xd8] sm:$0xff] %v312_v27 }
  0x33   : > { %315 = vst [vmem:[%s1969_s5 + $0xe0] sm:$0xff] %v314_v28 }
  0x34   : > { %317 = vst [vmem:[%s1969_s5 + $0xe8] sm:$0xff] %v316_v29 }
  0x35   : > { %319 = vst [vmem:[%s1969_s5 + $0xf0] sm:$0xff] %v318_v30 }
  0x36   : > { %321 = vst [vmem:[%s1969_s5 + $0xf8] sm:$0xff] %v320_v31 }
  0x37 PF: > { %p1531_p11 = scmp.ge.s32.totalorder %s1877_s17, 1  ;;  %p332_p12 = scmp.lt.s32.totalorder %s1877_s17, 3 }
  0x39   : > { %p333_p13 = pnand %p1531_p11, %p332_p12 }
  0x3a   : > { %s2035_s6 = sand.u32 (!%p333_p13), 1, %s1861_s13   ;;  %p378_p0 = scmp.lt.s32.totalorder (!%p333_p13), %s1869_s15, 1 }
  0x3b   : > { %336 = sbr.rel (%p333_p13) target bundleno = 403 (0x193), region = 66  ;;  %s1532_s7 = sshll.u32 (!%p333_p13), %s2035_s6, 8 }
  0x3c   : > { %s2038_s8 = scalar_lea.vmem (!%p333_p13), [#allocation2], %s1532_s7  ;;  %s1602_s21 = smul.u32 (!%p333_p13), 272, %s2035_s6 }
  0x3d   : > { %s1405_s30 = scalar_lea.sflag (!%p333_p13), [#allocation4], %s2035_s6 }
  0x3e   : > { %s2324_s23 = scalar_lea.vmem (!%p333_p13), [#allocation3], %s1602_s21 }
  0x3f   : > { %s1419_s28 = sshll.u32 (!%p333_p13), %s2324_s23, 4  ;;  %s1420_s28 = int_to_ptr.vmem [resolvable:$true] %s1419_s28 }
  0x40   : > { %v465_v32 = vld [vmem:[%s2038_s8 + $0x78] sm:$0xff]  ;;  %v464_v33 = vld [vmem:[%s2038_s8 + $0x70] sm:$0xff]  ;;  %v463_v36 = vld [vmem:[%s2038_s8 + $0x68] sm:$0xff]  ;;  %s379_s9 = scalar_select %p378_p0, %s1869_s15, 1 }
  0x41   : > { %v481_v34 = vld [vmem:[%s2038_s8 + $0xf8] sm:$0xff]  ;;  %486 = vmatpush.msra.mxu0 %v465_v32  ;;  %1570 = vmatpush.msra.mxu2 %v465_v32  ;;  %v480_v35 = vld [vmem:[%s2038_s8 + $0xf0] sm:$0xff]  ;;  %v479_v37 = vld [vmem:[%s2038_s8 + $0xe8] sm:$0xff] }
  0x42   : > { %605 = vmatpush.msra.mxu1 %v481_v34  ;;  %1586 = vmatpush.msra.mxu3 %v481_v34  ;;  %v462_v38 = vld [vmem:[%s2038_s8 + $0x60] sm:$0xff]  ;;  %v461_v40 = vld [vmem:[%s2038_s8 + $0x58] sm:$0xff]  ;;  %v460_v42 = vld [vmem:[%s2038_s8 + $0x50] sm:$0xff]  ;;  %s2075_s18 = scalar_lea.vmem %s2855_s2, %s379_s9  ;;  %s1819_s9 = scalar_lea.hbm %s2856_s3, 544 }
  0x43   : > { %487 = vmatpush.msra.mxu0 %v464_v33  ;;  %1571 = vmatpush.msra.mxu2 %v464_v33  ;;  %v478_v39 = vld [vmem:[%s2038_s8 + $0xe0] sm:$0xff]  ;;  %v477_v41 = vld [vmem:[%s2038_s8 + $0xd8] sm:$0xff]  ;;  %v476_v43 = vld [vmem:[%s2038_s8 + $0xd0] sm:$0xff] }
  0x44   : > { %606 = vmatpush.msra.mxu1 %v480_v35  ;;  %1587 = vmatpush.msra.mxu3 %v480_v35  ;;  %v459_v44 = vld [vmem:[%s2038_s8 + $0x48] sm:$0xff]  ;;  %v458_v46 = vld [vmem:[%s2038_s8 + $0x40] sm:$0xff]  ;;  %v457_v48 = vld [vmem:[%s2038_s8 + $0x38] sm:$0xff] }
  0x45   : > { %488 = vmatpush.msra.mxu0 %v463_v36  ;;  %1572 = vmatpush.msra.mxu2 %v463_v36  ;;  %v475_v45 = vld [vmem:[%s2038_s8 + $0xc8] sm:$0xff]  ;;  %v474_v47 = vld [vmem:[%s2038_s8 + $0xc0] sm:$0xff]  ;;  %v473_v49 = vld [vmem:[%s2038_s8 + $0xb8] sm:$0xff] }
  0x46   : > { %607 = vmatpush.msra.mxu1 %v479_v37  ;;  %1588 = vmatpush.msra.mxu3 %v479_v37  ;;  %v456_v50 = vld [vmem:[%s2038_s8 + $0x30] sm:$0xff]  ;;  %v455_v52 = vld [vmem:[%s2038_s8 + $0x28] sm:$0xff]  ;;  %v454_v54 = vld [vmem:[%s2038_s8 + $0x20] sm:$0xff] }
  0x47   : > { %489 = vmatpush.msra.mxu0 %v462_v38  ;;  %1573 = vmatpush.msra.mxu2 %v462_v38  ;;  %v472_v51 = vld [vmem:[%s2038_s8 + $0xb0] sm:$0xff]  ;;  %v471_v53 = vld [vmem:[%s2038_s8 + $0xa8] sm:$0xff]  ;;  %v470_v55 = vld [vmem:[%s2038_s8 + $0xa0] sm:$0xff] }
  0x48   : > { %608 = vmatpush.msra.mxu1 %v478_v39  ;;  %1589 = vmatpush.msra.mxu3 %v478_v39  ;;  %v453_v56 = vld [vmem:[%s2038_s8 + $0x18] sm:$0xff]  ;;  %v452_v58 = vld [vmem:[%s2038_s8 + $0x10] sm:$0xff]  ;;  %v451_v60 = vld [vmem:[%s2038_s8 + $0x8] sm:$0xff] }
  0x49   : > { %490 = vmatpush.msra.mxu0 %v461_v40  ;;  %1574 = vmatpush.msra.mxu2 %v461_v40  ;;  %v469_v57 = vld [vmem:[%s2038_s8 + $0x98] sm:$0xff]  ;;  %v468_v59 = vld [vmem:[%s2038_s8 + $0x90] sm:$0xff]  ;;  %v467_v61 = vld [vmem:[%s2038_s8 + $0x88] sm:$0xff] }
  0x4a   : > { %609 = vmatpush.msra.mxu1 %v477_v41  ;;  %1590 = vmatpush.msra.mxu3 %v477_v41  ;;  %v450_v62 = vld [vmem:[%s2038_s8] sm:$0xff]  ;;  %v416_v0 = vld [vmem:[%s2853_s0 + $0x110] sm:$0xff]  ;;  %v383_v2 = vld [vmem:[%s2853_s0 + $0x8] sm:$0xff] }
  0x4b   : > { %491 = vmatpush.msra.mxu0 %v460_v42  ;;  %1575 = vmatpush.msra.mxu2 %v460_v42  ;;  %v382_v63 = vld [vmem:[%s2853_s0] sm:$0xff]  ;;  %v417_v3 = vld [vmem:[%s2853_s0 + $0x118] sm:$0xff]  ;;  %v384_v4 = vld [vmem:[%s2853_s0 + $0x10] sm:$0xff] }
  0x4c   : > { %610 = vmatpush.msra.mxu1 %v476_v43  ;;  %1591 = vmatpush.msra.mxu3 %v476_v43  ;;  %v466_v1 = vld [vmem:[%s2038_s8 + $0x80] sm:$0xff]  ;;  %v385_v6 = vld [vmem:[%s2853_s0 + $0x18] sm:$0xff]  ;;  %v419_v7 = vld [vmem:[%s2853_s0 + $0x128] sm:$0xff] }
  0x4d   : > { %492 = vmatpush.msra.mxu0 %v459_v44  ;;  %1576 = vmatpush.msra.mxu2 %v459_v44  ;;  %v418_v5 = vld [vmem:[%s2853_s0 + $0x120] sm:$0xff]  ;;  %v420_v9 = vld [vmem:[%s2853_s0 + $0x130] sm:$0xff]  ;;  %v387_v10 = vld [vmem:[%s2853_s0 + $0x28] sm:$0xff] }
  0x4e   : > { %611 = vmatpush.msra.mxu1 %v475_v45  ;;  %1592 = vmatpush.msra.mxu3 %v475_v45  ;;  %v386_v8 = vld [vmem:[%s2853_s0 + $0x20] sm:$0xff]  ;;  %v421_v11 = vld [vmem:[%s2853_s0 + $0x138] sm:$0xff]  ;;  %v388_v12 = vld [vmem:[%s2853_s0 + $0x30] sm:$0xff] }
  0x4f   : > { %493 = vmatpush.msra.mxu0 %v458_v46  ;;  %1577 = vmatpush.msra.mxu2 %v458_v46  ;;  %v422_v13 = vld [vmem:[%s2853_s0 + $0x140] sm:$0xff]  ;;  %v389_v14 = vld [vmem:[%s2853_s0 + $0x38] sm:$0xff]  ;;  %v423_v15 = vld [vmem:[%s2853_s0 + $0x148] sm:$0xff] }
  0x50   : > { %612 = vmatpush.msra.mxu1 %v474_v47  ;;  %1593 = vmatpush.msra.mxu3 %v474_v47  ;;  %v390_v16 = vld [vmem:[%s2853_s0 + $0x40] sm:$0xff]  ;;  %v424_v17 = vld [vmem:[%s2853_s0 + $0x150] sm:$0xff]  ;;  %v391_v18 = vld [vmem:[%s2853_s0 + $0x48] sm:$0xff] }
  0x51   : > { %494 = vmatpush.msra.mxu0 %v457_v48  ;;  %1578 = vmatpush.msra.mxu2 %v457_v48  ;;  %v425_v19 = vld [vmem:[%s2853_s0 + $0x158] sm:$0xff]  ;;  %v392_v20 = vld [vmem:[%s2853_s0 + $0x50] sm:$0xff]  ;;  %v426_v21 = vld [vmem:[%s2853_s0 + $0x160] sm:$0xff] }
  0x52   : > { %613 = vmatpush.msra.mxu1 %v473_v49  ;;  %1594 = vmatpush.msra.mxu3 %v473_v49  ;;  %v393_v22 = vld [vmem:[%s2853_s0 + $0x58] sm:$0xff]  ;;  %v427_v23 = vld [vmem:[%s2853_s0 + $0x168] sm:$0xff]  ;;  %v394_v24 = vld [vmem:[%s2853_s0 + $0x60] sm:$0xff] }
  0x53   : > { %495 = vmatpush.msra.mxu0 %v456_v50  ;;  %1579 = vmatpush.msra.mxu2 %v456_v50  ;;  %v428_v25 = vld [vmem:[%s2853_s0 + $0x170] sm:$0xff]  ;;  %v395_v26 = vld [vmem:[%s2853_s0 + $0x68] sm:$0xff]  ;;  %v429_v27 = vld [vmem:[%s2853_s0 + $0x178] sm:$0xff] }
  0x54   : > { %614 = vmatpush.msra.mxu1 %v472_v51  ;;  %1595 = vmatpush.msra.mxu3 %v472_v51  ;;  %v396_v28 = vld [vmem:[%s2853_s0 + $0x70] sm:$0xff]  ;;  %v430_v29 = vld [vmem:[%s2853_s0 + $0x180] sm:$0xff]  ;;  %v397_v30 = vld [vmem:[%s2853_s0 + $0x78] sm:$0xff] }
  0x55   : > { %496 = vmatpush.msra.mxu0 %v455_v52  ;;  %1580 = vmatpush.msra.mxu2 %v455_v52  ;;  %v431_v31 = vld [vmem:[%s2853_s0 + $0x188] sm:$0xff]  ;;  %v398_v32 = vld [vmem:[%s2853_s0 + $0x80] sm:$0xff]  ;;  %v432_v33 = vld [vmem:[%s2853_s0 + $0x190] sm:$0xff] }
  0x56   : > { %615 = vmatpush.msra.mxu1 %v471_v53  ;;  %1596 = vmatpush.msra.mxu3 %v471_v53  ;;  %v399_v34 = vld [vmem:[%s2853_s0 + $0x88] sm:$0xff]  ;;  %v433_v35 = vld [vmem:[%s2853_s0 + $0x198] sm:$0xff]  ;;  %v400_v36 = vld [vmem:[%s2853_s0 + $0x90] sm:$0xff] }
  0x57   : > { %497 = vmatpush.msra.mxu0 %v454_v54  ;;  %1581 = vmatpush.msra.mxu2 %v454_v54  ;;  %v434_v37 = vld [vmem:[%s2853_s0 + $0x1a0] sm:$0xff]  ;;  %v401_v38 = vld [vmem:[%s2853_s0 + $0x98] sm:$0xff]  ;;  %v435_v39 = vld [vmem:[%s2853_s0 + $0x1a8] sm:$0xff] }
  0x58   : > { %616 = vmatpush.msra.mxu1 %v470_v55  ;;  %1597 = vmatpush.msra.mxu3 %v470_v55  ;;  %v402_v40 = vld [vmem:[%s2853_s0 + $0xa0] sm:$0xff]  ;;  %v436_v41 = vld [vmem:[%s2853_s0 + $0x1b0] sm:$0xff]  ;;  %v403_v42 = vld [vmem:[%s2853_s0 + $0xa8] sm:$0xff] }
  0x59   : > { %498 = vmatpush.msra.mxu0 %v453_v56  ;;  %1582 = vmatpush.msra.mxu2 %v453_v56  ;;  %v437_v43 = vld [vmem:[%s2853_s0 + $0x1b8] sm:$0xff]  ;;  %v404_v44 = vld [vmem:[%s2853_s0 + $0xb0] sm:$0xff]  ;;  %v438_v45 = vld [vmem:[%s2853_s0 + $0x1c0] sm:$0xff] }
  0x5a   : > { %617 = vmatpush.msra.mxu1 %v469_v57  ;;  %1598 = vmatpush.msra.mxu3 %v469_v57  ;;  %v405_v46 = vld [vmem:[%s2853_s0 + $0xb8] sm:$0xff]  ;;  %v439_v47 = vld [vmem:[%s2853_s0 + $0x1c8] sm:$0xff]  ;;  %v406_v48 = vld [vmem:[%s2853_s0 + $0xc0] sm:$0xff] }
  0x5b   : > { %499 = vmatpush.msra.mxu0 %v452_v58  ;;  %1583 = vmatpush.msra.mxu2 %v452_v58  ;;  %v440_v49 = vld [vmem:[%s2853_s0 + $0x1d0] sm:$0xff]  ;;  %v407_v50 = vld [vmem:[%s2853_s0 + $0xc8] sm:$0xff]  ;;  %v441_v51 = vld [vmem:[%s2853_s0 + $0x1d8] sm:$0xff] }
  0x5c   : > { %618 = vmatpush.msra.mxu1 %v468_v59  ;;  %1599 = vmatpush.msra.mxu3 %v468_v59  ;;  %v408_v52 = vld [vmem:[%s2853_s0 + $0xd0] sm:$0xff]  ;;  %v442_v53 = vld [vmem:[%s2853_s0 + $0x1e0] sm:$0xff]  ;;  %v409_v54 = vld [vmem:[%s2853_s0 + $0xd8] sm:$0xff] }
  0x5d   : > { %500 = vmatpush.msra.mxu0 %v451_v60  ;;  %1584 = vmatpush.msra.mxu2 %v451_v60  ;;  %v443_v55 = vld [vmem:[%s2853_s0 + $0x1e8] sm:$0xff]  ;;  %v410_v56 = vld [vmem:[%s2853_s0 + $0xe0] sm:$0xff]  ;;  %v444_v57 = vld [vmem:[%s2853_s0 + $0x1f0] sm:$0xff] }
  0x5e   : > { %619 = vmatpush.msra.mxu1 %v467_v61  ;;  %1600 = vmatpush.msra.mxu3 %v467_v61  ;;  %v411_v58 = vld [vmem:[%s2853_s0 + $0xe8] sm:$0xff]  ;;  %v445_v59 = vld [vmem:[%s2853_s0 + $0x1f8] sm:$0xff]  ;;  %v412_v60 = vld [vmem:[%s2853_s0 + $0xf0] sm:$0xff] }
  0x5f   : > { %501 = vmatpush.msra.mxu0 %v450_v62  ;;  %1585 = vmatpush.msra.mxu2 %v450_v62  ;;  %v446_v61 = vld [vmem:[%s2853_s0 + $0x200] sm:$0xff]  ;;  %v413_v62 = vld [vmem:[%s2853_s0 + $0xf8] sm:$0xff] }
  0x60   : > { %502 = vmatmul.f32.vlgmr.msra.gmra.mxu0 %v382_v63  ;;  %553 = vmatmul.f32.vlgmr.msra.gmra.mxu2 %v416_v0  ;;  %v447_v63 = vld [vmem:[%s2853_s0 + $0x208] sm:$0xff]  ;;  %v2272_v0 = vld [vmem:[%s2075_s18] ss:$0 sm:$0xff] }
  0x61   : > { %620 = vmatpush.msra.mxu1 %v466_v1  ;;  %1601 = vmatpush.msra.mxu3 %v466_v1 }
  0x62   : > { %621 = vmatmul.f32.vlgmr.msra.gmra.mxu1 %v383_v2  ;;  %672 = vmatmul.f32.vlgmr.msra.gmra.mxu3 %v417_v3  ;;  %v414_v2 = vld [vmem:[%s2853_s0 + $0x100] sm:$0xff]  ;;  %v448_v3 = vld [vmem:[%s2853_s0 + $0x210] sm:$0xff] }
  0x68   : > { %505 = vmatmul.f32.gmra.mxu0 %v384_v4  ;;  %556 = vmatmul.f32.gmra.mxu2 %v418_v5 }
  0x6a   : > { %624 = vmatmul.f32.gmra.mxu1 %v385_v6  ;;  %675 = vmatmul.f32.gmra.mxu3 %v419_v7  ;;  %v415_v6 = vld [vmem:[%s2853_s0 + $0x108] sm:$0xff]  ;;  %v449_v7 = vld [vmem:[%s2853_s0 + $0x218] sm:$0xff] }
  0x70   : > { %508 = vmatmul.f32.gmra.mxu0 %v386_v8  ;;  %559 = vmatmul.f32.gmra.mxu2 %v420_v9 }
  0x72   : > { %627 = vmatmul.f32.gmra.mxu1 %v387_v10  ;;  %678 = vmatmul.f32.gmra.mxu3 %v421_v11 }
  0x78   : > { %511 = vmatmul.f32.gmra.mxu0 %v388_v12  ;;  %562 = vmatmul.f32.gmra.mxu2 %v422_v13 }
  0x7a   : > { %630 = vmatmul.f32.gmra.mxu1 %v389_v14  ;;  %681 = vmatmul.f32.gmra.mxu3 %v423_v15 }
  0x80   : > { %514 = vmatmul.f32.gmra.mxu0 %v390_v16  ;;  %565 = vmatmul.f32.gmra.mxu2 %v424_v17 }
  0x82   : > { %633 = vmatmul.f32.gmra.mxu1 %v391_v18  ;;  %684 = vmatmul.f32.gmra.mxu3 %v425_v19 }
  0x88   : > { %517 = vmatmul.f32.gmra.mxu0 %v392_v20  ;;  %568 = vmatmul.f32.gmra.mxu2 %v426_v21 }
  0x8a   : > { %636 = vmatmul.f32.gmra.mxu1 %v393_v22  ;;  %687 = vmatmul.f32.gmra.mxu3 %v427_v23 }
  0x90   : > { %520 = vmatmul.f32.gmra.mxu0 %v394_v24  ;;  %571 = vmatmul.f32.gmra.mxu2 %v428_v25 }
  0x92   : > { %639 = vmatmul.f32.gmra.mxu1 %v395_v26  ;;  %690 = vmatmul.f32.gmra.mxu3 %v429_v27 }
  0x98   : > { %523 = vmatmul.f32.gmra.mxu0 %v396_v28  ;;  %574 = vmatmul.f32.gmra.mxu2 %v430_v29 }
  0x9a   : > { %642 = vmatmul.f32.gmra.mxu1 %v397_v30  ;;  %693 = vmatmul.f32.gmra.mxu3 %v431_v31 }
  0xa0   : > { %526 = vmatmul.f32.gmra.mxu0 %v398_v32  ;;  %577 = vmatmul.f32.gmra.mxu2 %v432_v33 }
  0xa2   : > { %645 = vmatmul.f32.gmra.mxu1 %v399_v34  ;;  %696 = vmatmul.f32.gmra.mxu3 %v433_v35 }
  0xa8   : > { %529 = vmatmul.f32.gmra.mxu0 %v400_v36  ;;  %580 = vmatmul.f32.gmra.mxu2 %v434_v37 }
  0xaa   : > { %648 = vmatmul.f32.gmra.mxu1 %v401_v38  ;;  %699 = vmatmul.f32.gmra.mxu3 %v435_v39 }
  0xb0   : > { %532 = vmatmul.f32.gmra.mxu0 %v402_v40  ;;  %583 = vmatmul.f32.gmra.mxu2 %v436_v41 }
  0xb2   : > { %651 = vmatmul.f32.gmra.mxu1 %v403_v42  ;;  %702 = vmatmul.f32.gmra.mxu3 %v437_v43 }
  0xb8   : > { %535 = vmatmul.f32.gmra.mxu0 %v404_v44  ;;  %586 = vmatmul.f32.gmra.mxu2 %v438_v45 }
  0xba   : > { %654 = vmatmul.f32.gmra.mxu1 %v405_v46  ;;  %705 = vmatmul.f32.gmra.mxu3 %v439_v47 }
  0xc0   : > { %538 = vmatmul.f32.gmra.mxu0 %v406_v48  ;;  %589 = vmatmul.f32.gmra.mxu2 %v440_v49 }
  0xc2   : > { %657 = vmatmul.f32.gmra.mxu1 %v407_v50  ;;  %708 = vmatmul.f32.gmra.mxu3 %v441_v51 }
  0xc8   : > { %541 = vmatmul.f32.gmra.mxu0 %v408_v52  ;;  %592 = vmatmul.f32.gmra.mxu2 %v442_v53 }
  0xca   : > { %660 = vmatmul.f32.gmra.mxu1 %v409_v54  ;;  %711 = vmatmul.f32.gmra.mxu3 %v443_v55 }
  0xd0   : > { %544 = vmatmul.f32.gmra.mxu0 %v410_v56  ;;  %595 = vmatmul.f32.gmra.mxu2 %v444_v57 }
  0xd2   : > { %663 = vmatmul.f32.gmra.mxu1 %v411_v58  ;;  %714 = vmatmul.f32.gmra.mxu3 %v445_v59 }
  0xd8   : > { %547 = vmatmul.f32.gmra.mxu0 %v412_v60  ;;  %598 = vmatmul.f32.gmra.mxu2 %v446_v61 }
  0xda   : > { %666 = vmatmul.f32.gmra.mxu1 %v413_v62  ;;  %717 = vmatmul.f32.gmra.mxu3 %v447_v63 }
  0xdd   : > { %v503_v1 = vpop.f32.mrf.mxu0 }
  0xde   : > { %v504_v4 = vadd.f32 %v2272_v0, %v503_v1 }
  0xdf   : > { %v622_v5 = vpop.f32.mrf.mxu1 }
  0xe0   : > { %v623_v8 = vadd.f32 %v622_v5, %v504_v4  ;;  %550 = vmatmul.f32.gmra.mxu0 %v414_v2  ;;  %601 = vmatmul.f32.gmra.mxu2 %v448_v3 }
  0xe2   : > { %v1533_v9 = vmul.f32 -1.442695, %v623_v8  ;;  %669 = vmatmul.f32.gmra.mxu1 %v415_v6  ;;  %720 = vmatmul.f32.gmra.mxu3 %v449_v7 }
  0xe3   : > { %v554_v10 = vpop.f32.mrf.mxu2 }
  0xe4   : > { %1662 = vpow2.f32 %v1533_v9  ;;  %v555_v11 = vadd.f32 %v2272_v0, %v554_v10 }
  0xe5   : > { %v506_v12 = vpop.f32.mrf.mxu0  ;;  %v673_v13 = vpop.f32.mrf.mxu3 }
  0xe6   : > { %v507_v14 = vadd.f32 %v2272_v0, %v506_v12  ;;  %v674_v15 = vadd.f32 %v673_v13, %v555_v11 }
  0xe7   : > { %v625_v16 = vpop.f32.mrf.mxu1 }
  0xe8   : > { %v1550_v17 = vmul.f32 -1.442695, %v674_v15  ;;  %v626_v18 = vadd.f32 %v625_v16, %v507_v14 }
  0xea   : > { %v1663_v19 = vpop.eup %1662  ;;  %1664 = vpow2.f32 %v1550_v17  ;;  %v1534_v20 = vmul.f32 -1.442695, %v626_v18 }
  0xeb   : > { %v826_v21 = vadd.f32 1.0, %v1663_v19  ;;  %v557_v22 = vpop.f32.mrf.mxu2 }
  0xec   : > { %1666 = vpow2.f32 %v1534_v20  ;;  %v558_v23 = vadd.f32 %v2272_v0, %v557_v22 }
  0xed   : > { %1668 = vrcp.f32 %v826_v21  ;;  %v509_v24 = vpop.f32.mrf.mxu0  ;;  %v676_v25 = vpop.f32.mrf.mxu3  ;;  %v869_v39 = vand.u32 2147483647, %v826_v21  ;;  %v871_v44 = vand.u32 2147483648, %v826_v21  ;;  %vm865_vm0 = vweird.f32 %v826_v21 }
  0xee   : > { %v510_v26 = vadd.f32 %v2272_v0, %v509_v24  ;;  %v677_v27 = vadd.f32 %v676_v25, %v558_v23 }
  0xef   : > { %v628_v28 = vpop.f32.mrf.mxu1  ;;  %vm2300_vm2 = vcmp.eq.f32.partialorder %v869_v39, 8.507059e+37  ;;  %v872_v57 = vor.u32 1.1754944e-38, %v871_v44 }
  0xf0   : > { %v1665_v29 = vpop.eup %1664  ;;  %v1551_v30 = vmul.f32 -1.442695, %v677_v27  ;;  %v629_v31 = vadd.f32 %v628_v28, %v510_v26 }
  0xf1   : > { %v2291_v32 = vadd.f32 1.0, %v1665_v29 }
  0xf2   : > { %v1667_v33 = vpop.eup %1666  ;;  %1670 = vpow2.f32 %v1551_v30  ;;  %v1535_v34 = vmul.f32 -1.442695, %v629_v31 }
  0xf3   : > { %v1669_v35 = vpop.eup %1668  ;;  %1672 = vrcp.f32 %v2291_v32  ;;  %v560_v36 = vpop.f32.mrf.mxu2  ;;  %v2294_v38 = vadd.f32 1.0, %v1667_v33  ;;  %v1124_v52 = vand.u32 2147483647, %v2291_v32  ;;  %v1126_v59 = vand.u32 2147483648, %v2291_v32 }
  0xf4   : > { %v861_v37 = vmul.f32 %v1669_v35, %v826_v21  ;;  %1674 = vpow2.f32 %v1535_v34  ;;  %v561_v40 = vadd.f32 %v2272_v0, %v560_v36  ;;  %vm866_vm1 = vweird.f32 %v1669_v35 }
  0xf5   : > { %v512_v41 = vpop.f32.mrf.mxu0  ;;  %v679_v42 = vpop.f32.mrf.mxu3  ;;  %1676 = vrcp.f32 %v2294_v38  ;;  %vm867_vm3 = vmor %vm865_vm0, %vm866_vm1  ;;  %vm1120_vm4 = vweird.f32 %v2291_v32  ;;  %v884_v60 = vand.u32 2147483647, %v2294_v38  ;;  %vm2316_vm5 = vcmp.eq.f32.partialorder %v1124_v52, 8.507059e+37 }
  0xf6   : > { %v862_v43 = vsub.f32 1.0, %v861_v37  ;;  %v513_v45 = vadd.f32 %v2272_v0, %v512_v41  ;;  %v680_v46 = vadd.f32 %v679_v42, %v561_v40  ;;  %v886_v7 = vand.u32 2147483648, %v2294_v38 }
  0xf7   : > { %v631_v47 = vpop.f32.mrf.mxu1  ;;  %v1127_v11 = vor.u32 1.1754944e-38, %v1126_v59  ;;  %vm880_vm7 = vweird.f32 %v2294_v38  ;;  %vm2329_vm8 = vcmp.eq.f32.partialorder %v884_v60, 8.507059e+37 }
  0xf8   : > { %v1671_v48 = vpop.eup %1670  ;;  %v863_v49 = vmul.f32 %v1669_v35, %v862_v43  ;;  %v1552_v54 = vmul.f32 -1.442695, %v680_v46  ;;  %v632_v61 = vadd.f32 %v631_v47, %v513_v45  ;;  %v887_v22 = vor.u32 1.1754944e-38, %v886_v7 }
  0xf9   : > { %v1673_v50 = vpop.eup %1672  ;;  %v2305_v53 = vadd.f32 1.0, %v1671_v48 }
  0xfa   : > { %v1675_v55 = vpop.eup %1674  ;;  %v864_v56 = vadd.f32 %v1669_v35, %v863_v49  ;;  %v1116_v58 = vmul.f32 %v1673_v50, %v2291_v32  ;;  %vm1121_vm6 = vweird.f32 %v1673_v50  ;;  %v1536_v14 = vmul.f32 -1.442695, %v632_v61 }
  0xfb   : > { %1678 = vrcp.f32 %v2305_v53  ;;  %v563_v62 = vpop.f32.mrf.mxu2  ;;  %v1677_v63 = vpop.eup %1676  ;;  %v2312_v3 = vadd.f32 1.0, %v1675_v55  ;;  %v1141_v17 = vand.u32 2147483648, %v2305_v53  ;;  %vm1122_vm9 = vmor %vm1120_vm4, %vm1121_vm6  ;;  %v1139_v26 = vand.u32 2147483647, %v2305_v53 }
  0xfc   : > { %v868_v1 = vsel %vm867_vm3, %v1669_v35, %v864_v56  ;;  %v1117_v2 = vsub.f32 1.0, %v1116_v58  ;;  %1680 = vpow2.f32 %v1552_v54  ;;  %v876_v6 = vmul.f32 %v1677_v63, %v2294_v38 }
  0xfd   : > { %v873_v4 = vsel %vm2300_vm2, %v872_v57, %v868_v1  ;;  %v515_v8 = vpop.f32.mrf.mxu0  ;;  %v682_v9 = vpop.f32.mrf.mxu3  ;;  %1682 = vrcp.f32 %v2312_v3  ;;  %v564_v18 = vadd.f32 %v2272_v0, %v563_v62  ;;  %vm881_vm10 = vweird.f32 %v1677_v63 }
  0xfe   : > { %1370 = vst [vmem:[%s2324_s23] sm:$0xff] %v873_v4  ;;  %v1118_v10 = vmul.f32 %v1673_v50, %v1117_v2  ;;  %v877_v12 = vsub.f32 1.0, %v876_v6  ;;  %v516_v19 = vadd.f32 %v2272_v0, %v515_v8  ;;  %1684 = vpow2.f32 %v1536_v14  ;;  %vm882_vm11 = vmor %vm880_vm7, %vm881_vm10 }
  0xff   : > { %v634_v15 = vpop.f32.mrf.mxu1  ;;  %v683_v27 = vadd.f32 %v682_v9, %v564_v18  ;;  %vm1135_vm12 = vweird.f32 %v2305_v53  ;;  %v1142_v35 = vor.u32 1.1754944e-38, %v1141_v17  ;;  %vm895_vm14 = vweird.f32 %v2312_v3 }
 0x100   : > { %v1119_v16 = vadd.f32 %v1673_v50, %v1118_v10  ;;  %v878_v21 = vmul.f32 %v1677_v63, %v877_v12  ;;  %v635_v31 = vadd.f32 %v634_v15, %v516_v19  ;;  %v899_v46 = vand.u32 2147483647, %v2312_v3 }
 0x101   : > { %v1679_v20 = vpop.eup %1678  ;;  %v1553_v36 = vmul.f32 -1.442695, %v683_v27  ;;  %vm1140_vm1 = vcmp.eq.f32.partialorder %v1139_v26, 8.507059e+37 }
 0x102   : > { %v1681_v23 = vpop.eup %1680  ;;  %v1123_v24 = vsel %vm1122_vm9, %v1673_v50, %v1119_v16  ;;  %v1131_v25 = vmul.f32 %v1679_v20, %v2305_v53  ;;  %v879_v29 = vadd.f32 %v1677_v63, %v878_v21  ;;  %vm1136_vm13 = vweird.f32 %v1679_v20 }
 0x103   : > { %v1128_v28 = vsel %vm2316_vm5, %v1127_v11, %v1123_v24  ;;  %v2342_v30 = vadd.f32 1.0, %v1681_v23  ;;  %v566_v32 = vpop.f32.mrf.mxu2  ;;  %v1683_v33 = vpop.eup %1682  ;;  %v1537_v47 = vmul.f32 -1.442695, %v635_v31  ;;  %v901_v50 = vand.u32 2147483648, %v2312_v3  ;;  %vm1137_vm15 = vmor %vm1135_vm12, %vm1136_vm13 }
 0x104   : > { %1387 = vst [vmem:[%s2324_s23 + $0x88] sm:$0xff] %v1128_v28  ;;  %v1132_v34 = vsub.f32 1.0, %v1131_v25  ;;  %v883_v37 = vsel %vm882_vm11, %v1677_v63, %v879_v29  ;;  %v891_v39 = vmul.f32 %v1683_v33, %v2312_v3  ;;  %v567_v40 = vadd.f32 %v2272_v0, %v566_v32  ;;  %v1685_v44 = vpop.eup %1684 }
 0x105   : > { %1686 = vrcp.f32 %v2342_v30  ;;  %v518_v41 = vpop.f32.mrf.mxu0  ;;  %v685_v42 = vpop.f32.mrf.mxu3  ;;  %v888_v43 = vsel %vm2329_vm8, %v887_v22, %v883_v37  ;;  %v2358_v51 = vadd.f32 1.0, %v1685_v44  ;;  %vm896_vm0 = vweird.f32 %v1683_v33 }
 0x106   : > { %v1133_v38 = vmul.f32 %v1679_v20, %v1132_v34  ;;  %1371 = vst [vmem:[%s2324_s23 + $0x8] sm:$0xff] %v888_v43  ;;  %v892_v45 = vsub.f32 1.0, %v891_v39  ;;  %1688 = vpow2.f32 %v1553_v36  ;;  %v519_v52 = vadd.f32 %v2272_v0, %v518_v41  ;;  %vm897_vm2 = vmor %vm895_vm14, %vm896_vm0 }
 0x107   : > { %v637_v48 = vpop.f32.mrf.mxu1  ;;  %1690 = vpow2.f32 %v1537_v47  ;;  %v686_v55 = vadd.f32 %v685_v42, %v567_v40  ;;  %v1154_v60 = vand.u32 2147483647, %v2342_v30  ;;  %v902_v53 = vor.u32 1.1754944e-38, %v901_v50 }
 0x108   : > { %v1134_v49 = vadd.f32 %v1679_v20, %v1133_v38  ;;  %v893_v54 = vmul.f32 %v1683_v33, %v892_v45  ;;  %1692 = vrcp.f32 %v2358_v51  ;;  %v1156_v1 = vand.u32 2147483648, %v2342_v30 }
 0x109   : > { %v1554_v61 = vmul.f32 -1.442695, %v686_v55  ;;  %v638_v2 = vadd.f32 %v637_v48, %v519_v52  ;;  %vm900_vm3 = vcmp.eq.f32.partialorder %v899_v46, 8.507059e+37  ;;  %vm1150_vm4 = vweird.f32 %v2342_v30 }
 0x10a   : > { %v1138_v56 = vsel %vm1137_vm15, %v1679_v20, %v1134_v49  ;;  %v894_v59 = vadd.f32 %v1683_v33, %v893_v54  ;;  %vm2375_vm5 = vcmp.eq.f32.partialorder %v1154_v60, 8.507059e+37  ;;  %v1157_v18 = vor.u32 1.1754944e-38, %v1156_v1 }
 0x10b   : > { %v1687_v57 = vpop.eup %1686  ;;  %v1143_v58 = vsel %vm1140_vm1, %v1142_v35, %v1138_v56  ;;  %v569_v62 = vpop.f32.mrf.mxu2  ;;  %1694 = vpow2.f32 %v1554_v61  ;;  %v1538_v3 = vmul.f32 -1.442695, %v638_v2  ;;  %vm910_vm7 = vweird.f32 %v2358_v51 }
 0x10c   : > { %1388 = vst [vmem:[%s2324_s23 + $0x90] sm:$0xff] %v1143_v58  ;;  %v1146_v63 = vmul.f32 %v1687_v57, %v2342_v30  ;;  %v1689_v4 = vpop.eup %1688  ;;  %v898_v5 = vsel %vm897_vm2, %v1683_v33, %v894_v59  ;;  %v570_v6 = vadd.f32 %v2272_v0, %v569_v62  ;;  %vm1151_vm6 = vweird.f32 %v1687_v57 }
 0x10d   : > { %v521_v7 = vpop.f32.mrf.mxu0  ;;  %v688_v8 = vpop.f32.mrf.mxu3  ;;  %v903_v9 = vsel %vm900_vm3, %v902_v53, %v898_v5  ;;  %v2371_v11 = vadd.f32 1.0, %v1689_v4  ;;  %v914_v23 = vand.u32 2147483647, %v2358_v51  ;;  %vm1152_vm8 = vmor %vm1150_vm4, %vm1151_vm6  ;;  %v916_v27 = vand.u32 2147483648, %v2358_v51 }
 0x10e   : > { %v1147_v10 = vsub.f32 1.0, %v1146_v63  ;;  %v1691_v12 = vpop.eup %1690  ;;  %1372 = vst [vmem:[%s2324_s23 + $0x10] sm:$0xff] %v903_v9  ;;  %v689_v14 = vadd.f32 %v688_v8, %v570_v6  ;;  %v522_v21 = vadd.f32 %v2272_v0, %v521_v7 }
 0x10f   : > { %v640_v15 = vpop.f32.mrf.mxu1  ;;  %v1693_v16 = vpop.eup %1692  ;;  %1696 = vrcp.f32 %v2371_v11  ;;  %v2382_v20 = vadd.f32 1.0, %v1691_v12  ;;  %v1169_v28 = vand.u32 2147483647, %v2371_v11  ;;  %v1171_v32 = vand.u32 2147483648, %v2371_v11 }
 0x110   : > { %v1148_v17 = vmul.f32 %v1687_v57, %v1147_v10  ;;  %v906_v19 = vmul.f32 %v1693_v16, %v2358_v51  ;;  %1698 = vpow2.f32 %v1538_v3  ;;  %v1555_v24 = vmul.f32 -1.442695, %v689_v14 }
 0x111   : > { %v1695_v25 = vpop.eup %1694  ;;  %1700 = vrcp.f32 %v2382_v20  ;;  %vm911_vm9 = vweird.f32 %v1693_v16  ;;  %v641_v35 = vadd.f32 %v640_v15, %v522_v21  ;;  %vm2397_vm10 = vcmp.eq.f32.partialorder %v914_v23, 8.507059e+37 }
 0x112   : > { %v1149_v22 = vadd.f32 %v1687_v57, %v1148_v17  ;;  %v907_v26 = vsub.f32 1.0, %v906_v19  ;;  %v2392_v33 = vadd.f32 1.0, %v1695_v25  ;;  %1702 = vpow2.f32 %v1555_v24  ;;  %vm912_vm12 = vmor %vm910_vm7, %vm911_vm9 }
 0x113   : > { %v572_v29 = vpop.f32.mrf.mxu2  ;;  %v929_v41 = vand.u32 2147483647, %v2382_v20  ;;  %v917_v43 = vor.u32 1.1754944e-38, %v916_v27  ;;  %vm1165_vm11 = vweird.f32 %v2371_v11  ;;  %vm2408_vm13 = vcmp.eq.f32.partialorder %v1169_v28, 8.507059e+37 }
 0x114   : > { %v1153_v31 = vsel %vm1152_vm8, %v1687_v57, %v1149_v22  ;;  %v908_v30 = vmul.f32 %v1693_v16, %v907_v26  ;;  %1704 = vrcp.f32 %v2392_v33  ;;  %v1172_v47 = vor.u32 1.1754944e-38, %v1171_v32 }
 0x115   : > { %v1158_v34 = vsel %vm2375_vm5, %v1157_v18, %v1153_v31  ;;  %v524_v36 = vpop.f32.mrf.mxu0  ;;  %v691_v37 = vpop.f32.mrf.mxu3  ;;  %vm925_vm14 = vweird.f32 %v2382_v20  ;;  %v1539_v48 = vmul.f32 -1.442695, %v641_v35  ;;  %v931_v54 = vand.u32 2147483648, %v2382_v20 }
 0x116   : > { %v1697_v39 = vpop.eup %1696  ;;  %1389 = vst [vmem:[%s2324_s23 + $0x98] sm:$0xff] %v1158_v34  ;;  %v909_v42 = vadd.f32 %v1693_v16, %v908_v30  ;;  %vm2419_vm0 = vcmp.eq.f32.partialorder %v929_v41, 8.507059e+37  ;;  %v1184_v58 = vand.u32 2147483647, %v2392_v33  ;;  %v1186_v61 = vand.u32 2147483648, %v2392_v33 }
 0x117   : > { %v1161_v38 = vmul.f32 %v1697_v39, %v2371_v11  ;;  %v643_v44 = vpop.f32.mrf.mxu1  ;;  %v1699_v45 = vpop.eup %1698  ;;  %vm1166_vm15 = vweird.f32 %v1697_v39  ;;  %v573_v62 = vadd.f32 %v2272_v0, %v572_v29  ;;  %v525_v4 = vadd.f32 %v2272_v0, %v524_v36 }
 0x118   : > { %v1701_v49 = vpop.eup %1700  ;;  %v913_v50 = vsel %vm912_vm12, %v1693_v16, %v909_v42  ;;  %v2414_v55 = vadd.f32 1.0, %v1699_v45  ;;  %v932_v6 = vor.u32 1.1754944e-38, %v931_v54  ;;  %vm1180_vm1 = vweird.f32 %v2392_v33  ;;  %vm1167_vm2 = vmor %vm1165_vm11, %vm1166_vm15 }
 0x119   : > { %v1162_v52 = vsub.f32 1.0, %v1161_v38  ;;  %v918_v51 = vsel %vm2397_vm10, %v917_v43, %v913_v50  ;;  %v921_v56 = vmul.f32 %v1701_v49, %v2382_v20  ;;  %v1703_v59 = vpop.eup %1702  ;;  %vm926_vm3 = vweird.f32 %v1701_v49 }
 0x11a   : > { %1373 = vst [vmem:[%s2324_s23 + $0x18] sm:$0xff] %v918_v51  ;;  %1706 = vrcp.f32 %v2414_v55  ;;  %v1705_v63 = vpop.eup %1704  ;;  %v2428_v2 = vadd.f32 1.0, %v1703_v59  ;;  %vm2436_vm4 = vcmp.eq.f32.partialorder %v1184_v58, 8.507059e+37  ;;  %v1187_v14 = vor.u32 1.1754944e-38, %v1186_v61  ;;  %vm927_vm6 = vmor %vm925_vm14, %vm926_vm3 }
 0x11b   : > { %v1163_v60 = vmul.f32 %v1697_v39, %v1162_v52  ;;  %v575_v53 = vpop.f32.mrf.mxu2  ;;  %v922_v1 = vsub.f32 1.0, %v921_v56  ;;  %1708 = vpow2.f32 %v1539_v48  ;;  %v1176_v7 = vmul.f32 %v1705_v63, %v2392_v33 }
 0x11c   : > { %1710 = vrcp.f32 %v2428_v2  ;;  %vm940_vm5 = vweird.f32 %v2414_v55  ;;  %v692_v17 = vadd.f32 %v691_v37, %v573_v62  ;;  %v644_v18 = vadd.f32 %v643_v44, %v525_v4 }
 0x11d   : > { %v1164_v5 = vadd.f32 %v1697_v39, %v1163_v60  ;;  %v527_v8 = vpop.f32.mrf.mxu0  ;;  %v694_v9 = vpop.f32.mrf.mxu3  ;;  %v923_v10 = vmul.f32 %v1701_v49, %v922_v1  ;;  %v1177_v13 = vsub.f32 1.0, %v1176_v7  ;;  %vm1181_vm7 = vweird.f32 %v1705_v63 }
 0x11e   : > { %v944_v22 = vand.u32 2147483647, %v2414_v55  ;;  %v576_v23 = vadd.f32 %v2272_v0, %v575_v53  ;;  %v946_v27 = vand.u32 2147483648, %v2414_v55  ;;  %v1556_v28 = vmul.f32 -1.442695, %v692_v17  ;;  %vm1182_vm8 = vmor %vm1180_vm1, %vm1181_vm7 }
 0x11f   : > { %v1168_v12 = vsel %vm1167_vm2, %v1697_v39, %v1164_v5  ;;  %v646_v15 = vpop.f32.mrf.mxu1  ;;  %v924_v11 = vadd.f32 %v1701_v49, %v923_v10  ;;  %v1178_v21 = vmul.f32 %v1705_v63, %v1177_v13  ;;  %v1540_v32 = vmul.f32 -1.442695, %v644_v18 }
 0x120   : > { %v1173_v16 = vsel %vm2408_vm13, %v1172_v47, %v1168_v12  ;;  %v1707_v19 = vpop.eup %1706  ;;  %1712 = vpow2.f32 %v1556_v28  ;;  %v528_v36 = vadd.f32 %v2272_v0, %v527_v8  ;;  %v695_v37 = vadd.f32 %v694_v9, %v576_v23 }
 0x121   : > { %1390 = vst [vmem:[%s2324_s23 + $0xa0] sm:$0xff] %v1173_v16  ;;  %v1709_v24 = vpop.eup %1708  ;;  %v928_v25 = vsel %vm927_vm6, %v1701_v49, %v924_v11  ;;  %v936_v26 = vmul.f32 %v1707_v19, %v2414_v55  ;;  %v1179_v31 = vadd.f32 %v1705_v63, %v1178_v21  ;;  %vm2460_vm9 = vcmp.eq.f32.partialorder %v944_v22, 8.507059e+37 }
 0x122   : > { %v933_v29 = vsel %vm2419_vm0, %v932_v6, %v928_v25  ;;  %v2453_v20 = vadd.f32 1.0, %v1709_v24  ;;  %v1711_v30 = vpop.eup %1710  ;;  %vm941_vm10 = vweird.f32 %v1707_v19  ;;  %v947_v44 = vor.u32 1.1754944e-38, %v946_v27 }
 0x123   : > { %v578_v34 = vpop.f32.mrf.mxu2  ;;  %1374 = vst [vmem:[%s2324_s23 + $0x20] sm:$0xff] %v933_v29  ;;  %v937_v35 = vsub.f32 1.0, %v936_v26  ;;  %v1183_v39 = vsel %vm1182_vm8, %v1705_v63, %v1179_v31  ;;  %v1191_v41 = vmul.f32 %v1711_v30, %v2428_v2  ;;  %v1199_v46 = vand.u32 2147483647, %v2428_v2  ;;  %vm942_vm11 = vmor %vm940_vm5, %vm941_vm10 }
 0x124   : > { %1714 = vrcp.f32 %v2453_v20  ;;  %v1188_v33 = vsel %vm2436_vm4, %v1187_v14, %v1183_v39  ;;  %v1557_v47 = vmul.f32 -1.442695, %v695_v37  ;;  %v1201_v50 = vand.u32 2147483648, %v2428_v2 }
 0x125   : > { %v530_v42 = vpop.f32.mrf.mxu0  ;;  %v697_v43 = vpop.f32.mrf.mxu3  ;;  %v938_v38 = vmul.f32 %v1707_v19, %v937_v35  ;;  %1391 = vst [vmem:[%s2324_s23 + $0xa8] sm:$0xff] %v1188_v33  ;;  %v1192_v45 = vsub.f32 1.0, %v1191_v41  ;;  %1716 = vpow2.f32 %v1540_v32  ;;  %v647_v52 = vadd.f32 %v646_v15, %v528_v36 }
 0x126   : > { %v579_v54 = vadd.f32 %v2272_v0, %v578_v34  ;;  %vm1196_vm12 = vweird.f32 %v1711_v30  ;;  %1718 = vpow2.f32 %v1557_v47  ;;  %v531_v56 = vadd.f32 %v2272_v0, %v530_v42  ;;  %v1713_v57 = vpop.eup %1712 }
 0x127   : > { %v649_v48 = vpop.f32.mrf.mxu1  ;;  %v939_v49 = vadd.f32 %v1707_v19, %v938_v38  ;;  %v1193_v51 = vmul.f32 %v1711_v30, %v1192_v45  ;;  %vm1195_vm13 = vweird.f32 %v2428_v2  ;;  %v1541_v59 = vmul.f32 -1.442695, %v647_v52 }
 0x128   : > { %v698_v60 = vadd.f32 %v697_v43, %v579_v54  ;;  %v2478_v63 = vadd.f32 1.0, %v1713_v57  ;;  %v650_v55 = vadd.f32 %v649_v48, %v531_v56  ;;  %vm1197_vm14 = vmor %vm1195_vm13, %vm1196_vm12  ;;  %v1202_v4 = vor.u32 1.1754944e-38, %v1201_v50 }
 0x129   : > { %v943_v58 = vsel %vm942_vm11, %v1707_v19, %v939_v49  ;;  %v1194_v53 = vadd.f32 %v1711_v30, %v1193_v51  ;;  %1720 = vpow2.f32 %v1541_v59  ;;  %vm1200_vm15 = vcmp.eq.f32.partialorder %v1199_v46, 8.507059e+37 }
 0x12a   : > { %v1715_v61 = vpop.eup %1714  ;;  %v948_v62 = vsel %vm2460_vm9, %v947_v44, %v943_v58  ;;  %v1558_v2 = vmul.f32 -1.442695, %v698_v60  ;;  %vm955_vm0 = vweird.f32 %v2453_v20  ;;  %1722 = vrcp.f32 %v2478_v63 }
 0x12b   : > { %v581_v1 = vpop.f32.mrf.mxu2  ;;  %1375 = vst [vmem:[%s2324_s23 + $0x28] sm:$0xff] %v948_v62  ;;  %v951_v5 = vmul.f32 %v1715_v61, %v2453_v20  ;;  %v1717_v6 = vpop.eup %1716  ;;  %v1198_v7 = vsel %vm1197_vm14, %v1711_v30, %v1194_v53  ;;  %v959_v12 = vand.u32 2147483647, %v2453_v20  ;;  %vm956_vm1 = vweird.f32 %v1715_v61 }
 0x12c   : > { %v1203_v10 = vsel %vm1200_vm15, %v1202_v4, %v1198_v7  ;;  %v2486_v13 = vadd.f32 1.0, %v1717_v6  ;;  %v1719_v14 = vpop.eup %1718  ;;  %v961_v15 = vand.u32 2147483648, %v2453_v20  ;;  %1724 = vpow2.f32 %v1558_v2  ;;  %vm957_vm3 = vmor %vm955_vm0, %vm956_vm1 }
 0x12d   : > { %v533_v8 = vpop.f32.mrf.mxu0  ;;  %v700_v9 = vpop.f32.mrf.mxu3  ;;  %v952_v3 = vsub.f32 1.0, %v951_v5  ;;  %1392 = vst [vmem:[%s2324_s23 + $0xb0] sm:$0xff] %v1203_v10  ;;  %v1542_v16 = vmul.f32 -1.442695, %v650_v55  ;;  %v1214_v18 = vand.u32 2147483647, %v2478_v63  ;;  %v582_v19 = vadd.f32 %v2272_v0, %v581_v1 }
 0x12e   : > { %1726 = vrcp.f32 %v2486_v13  ;;  %v1216_v21 = vand.u32 2147483648, %v2478_v63  ;;  %v2494_v22 = vadd.f32 1.0, %v1719_v14  ;;  %vm960_vm2 = vcmp.eq.f32.partialorder %v959_v12, 8.507059e+37 }
 0x12f   : > { %v652_v11 = vpop.f32.mrf.mxu1  ;;  %v953_v17 = vmul.f32 %v1715_v61, %v952_v3  ;;  %v1721_v23 = vpop.eup %1720  ;;  %1728 = vpow2.f32 %v1542_v16  ;;  %v962_v26 = vor.u32 1.1754944e-38, %v961_v15  ;;  %vm1210_vm4 = vweird.f32 %v2478_v63 }
 0x130   : > { %v1723_v25 = vpop.eup %1722  ;;  %v974_v27 = vand.u32 2147483647, %v2486_v13  ;;  %1730 = vrcp.f32 %v2494_v22  ;;  %vm2505_vm5 = vcmp.eq.f32.partialorder %v1214_v18, 8.507059e+37  ;;  %v976_v20 = vand.u32 2147483648, %v2486_v13 }
 0x131   : > { %v954_v24 = vadd.f32 %v1715_v61, %v953_v17  ;;  %v1206_v31 = vmul.f32 %v1723_v25, %v2478_v63  ;;  %v701_v34 = vadd.f32 %v700_v9, %v582_v19  ;;  %v1217_v36 = vor.u32 1.1754944e-38, %v1216_v21 }
 0x132   : > { %v1725_v30 = vpop.eup %1724  ;;  %v2510_v37 = vadd.f32 1.0, %v1721_v23  ;;  %v534_v39 = vadd.f32 %v2272_v0, %v533_v8  ;;  %v1229_v43 = vand.u32 2147483647, %v2494_v22  ;;  %v1231_v33 = vand.u32 2147483648, %v2494_v22 }
 0x133   : > { %v2502_v28 = vpop.f32.mrf.mxu2  ;;  %v958_v29 = vsel %vm957_vm3, %v1715_v61, %v954_v24  ;;  %v1207_v42 = vsub.f32 1.0, %v1206_v31  ;;  %v2518_v38 = vadd.f32 1.0, %v1725_v30  ;;  %vm970_vm6 = vweird.f32 %v2486_v13 }
 0x134   : > { %v963_v35 = vsel %vm960_vm2, %v962_v26, %v958_v29  ;;  %v1727_v41 = vpop.eup %1726  ;;  %vm2524_vm7 = vcmp.eq.f32.partialorder %v974_v27, 8.507059e+37  ;;  %1732 = vrcp.f32 %v2510_v37  ;;  %vm1211_vm8 = vweird.f32 %v1723_v25 }
 0x135   : > { %v2513_v40 = vpop.f32.mrf.mxu3  ;;  %1376 = vst [vmem:[%s2324_s23 + $0x30] sm:$0xff] %v963_v35  ;;  %v2520_v44 = vpop.f32.mrf.mxu0  ;;  %v966_v45 = vmul.f32 %v1727_v41, %v2486_v13  ;;  %v1208_v48 = vmul.f32 %v1723_v25, %v1207_v42  ;;  %v977_v49 = vor.u32 1.1754944e-38, %v976_v20  ;;  %v1559_v50 = vmul.f32 -1.442695, %v701_v34  ;;  %vm1212_vm12 = vmor %vm1210_vm4, %vm1211_vm8 }
 0x136   : > { %v1729_v47 = vpop.eup %1728  ;;  %vm1225_vm9 = vweird.f32 %v2494_v22  ;;  %1734 = vrcp.f32 %v2518_v38  ;;  %v653_v51 = vadd.f32 %v652_v11, %v534_v39  ;;  %vm971_vm10 = vweird.f32 %v1727_v41 }
 0x137   : > { %v1731_v52 = vpop.eup %1730  ;;  %v967_v54 = vsub.f32 1.0, %v966_v45  ;;  %v2531_v56 = vpop.f32.mrf.mxu1  ;;  %v1209_v57 = vadd.f32 %v1723_v25, %v1208_v48  ;;  %vm2534_vm11 = vcmp.eq.f32.partialorder %v1229_v43, 8.507059e+37  ;;  %v1232_v60 = vor.u32 1.1754944e-38, %v1231_v33  ;;  %vm972_vm14 = vmor %vm970_vm6, %vm971_vm10 }
 0x138   : > { %v1221_v58 = vmul.f32 %v1731_v52, %v2494_v22  ;;  %vm985_vm13 = vweird.f32 %v2510_v37  ;;  %v989_v62 = vand.u32 2147483647, %v2510_v37  ;;  %v991_v53 = vand.u32 2147483648, %v2510_v37 }
 0x139   : > { %v968_v61 = vmul.f32 %v1727_v41, %v967_v54  ;;  %v1213_v1 = vsel %vm1212_vm12, %v1723_v25, %v1209_v57  ;;  %v2543_v5 = vadd.f32 1.0, %v1729_v47  ;;  %1736 = vpow2.f32 %v1559_v50 }
 0x13a   : > { %v1222_v4 = vsub.f32 1.0, %v1221_v58  ;;  %v1733_v2 = vpop.eup %1732  ;;  %v1218_v6 = vsel %vm2505_vm5, %v1217_v36, %v1213_v1  ;;  %v1244_v7 = vand.u32 2147483647, %v2518_v38  ;;  %v1543_v8 = vmul.f32 -1.442695, %v653_v51 }
 0x13b   : > { %v587_v55 = vpop.f32.mrf.mxu2  ;;  %v969_v63 = vadd.f32 %v1727_v41, %v968_v61  ;;  %1393 = vst [vmem:[%s2324_s23 + $0xb8] sm:$0xff] %v1218_v6  ;;  %vm1226_vm15 = vweird.f32 %v1731_v52  ;;  %v981_v10 = vmul.f32 %v1733_v2, %v2510_v37  ;;  %1738 = vrcp.f32 %v2543_v5 }
 0x13c   : > { %v1223_v9 = vmul.f32 %v1731_v52, %v1222_v4  ;;  %v1735_v12 = vpop.eup %1734  ;;  %vm2556_vm0 = vcmp.eq.f32.partialorder %v989_v62, 8.507059e+37  ;;  %vm1240_vm1 = vweird.f32 %v2518_v38  ;;  %v1246_v13 = vand.u32 2147483648, %v2518_v38  ;;  %vm1227_vm2 = vmor %vm1225_vm9, %vm1226_vm15 }
 0x13d   : > { %v2554_v3 = vpop.f32.mrf.mxu3  ;;  %v973_v14 = vsel %vm972_vm14, %v1727_v41, %v969_v63  ;;  %v982_v17 = vsub.f32 1.0, %v981_v10  ;;  %v1236_v18 = vmul.f32 %v1735_v12, %v2518_v38  ;;  %v539_v19 = vpop.f32.mrf.mxu0  ;;  %vm986_vm3 = vweird.f32 %v1733_v2  ;;  %v2614_v10 = vld [vmem:[%s2075_s18] ss:$0 sm:$0xff]  ;;  %s1567_s18 = sshll.u32 %s1869_s15, 3 }
 0x13e   : > { %v978_v16 = vsel %vm2524_vm7, %v977_v49, %v973_v14  ;;  %v1224_v11 = vadd.f32 %v1731_v52, %v1223_v9  ;;  %v992_v21 = vor.u32 1.1754944e-38, %v991_v53  ;;  %vm2569_vm4 = vcmp.eq.f32.partialorder %v1244_v7, 8.507059e+37  ;;  %vm987_vm6 = vmor %vm985_vm13, %vm986_vm3  ;;  %s1418_s27 = scalar_lea.hbm %s2856_s3, %s1567_s18 }
 0x13f   : > { %1377 = vst [vmem:[%s2324_s23 + $0x38] sm:$0xff] %v978_v16  ;;  %1740 = vpow2.f32 %v1543_v8  ;;  %v1737_v24 = vpop.eup %1736  ;;  %v983_v26 = vmul.f32 %v1733_v2, %v982_v17  ;;  %v1237_v27 = vsub.f32 1.0, %v1236_v18  ;;  %v585_v29 = vadd.f32 %v2272_v0, %v2502_v28  ;;  %v658_v34 = vpop.f32.mrf.mxu1  ;;  %s1421_s29 = sshll.u32 %s1418_s27, 4  ;;  %s1422_s29 = int_to_ptr.hbm [resolvable:$true] %s1421_s29 }
 0x140   : > { %v1228_v25 = vsel %vm1227_vm2, %v1731_v52, %v1224_v11  ;;  %v1247_v22 = vor.u32 1.1754944e-38, %v1246_v13  ;;  %v2577_v32 = vadd.f32 1.0, %v1737_v24  ;;  %v537_v20 = vadd.f32 %v2272_v0, %v2520_v44  ;;  %s1813_s4 = sshra.s32 %s1422_s29, 4  ;;  %s1814_s4 = int_to_ptr.hbm [resolvable:$true] %s1813_s4 }
 0x141   : > { %v1233_v31 = vsel %vm2534_vm11, %v1232_v60, %v1228_v25  ;;  %v1739_v30 = vpop.eup %1738  ;;  %v984_v35 = vadd.f32 %v1733_v2, %v983_v26  ;;  %v1238_v36 = vmul.f32 %v1735_v12, %v1237_v27  ;;  %vm1241_vm5 = vweird.f32 %v1735_v12  ;;  %s1815_s5 = scalar_lea.hbm %s1814_s4, 272  ;;  %p1820_p4 = scmp.lt.s32.totalorder %s1814_s4, %s2856_s3 }
 0x142   : > { %1394 = vst [vmem:[%s2324_s23 + $0xc0] sm:$0xff] %v1233_v31  ;;  %v704_v39 = vadd.f32 %v2513_v40, %v585_v29  ;;  %v996_v28 = vmul.f32 %v1739_v30, %v2543_v5  ;;  %vm1000_vm7 = vweird.f32 %v2543_v5  ;;  %v1004_v42 = vand.u32 2147483647, %v2543_v5  ;;  %vm1242_vm8 = vmor %vm1240_vm1, %vm1241_vm5  ;;  %p1816_p1 = scmp.ne.s32.totalorder %s1814_s4, %s1815_s5  ;;  %p1821_p6 = scmp.lt.s32.totalorder %s1819_s9, %s1815_s5 }
 0x143   : > { %v590_v41 = vpop.f32.mrf.mxu2  ;;  %1742 = vrcp.f32 %v2577_v32  ;;  %v988_v43 = vsel %vm987_vm6, %v1733_v2, %v984_v35  ;;  %v1239_v33 = vadd.f32 %v1735_v12, %v1238_v36  ;;  %v588_v44 = vadd.f32 %v2272_v0, %v587_v55 }
 0x144   : > { %v540_v40 = vadd.f32 %v2272_v0, %v539_v19  ;;  %v993_v37 = vsel %vm2556_vm0, %v992_v21, %v988_v43  ;;  %v997_v46 = vsub.f32 1.0, %v996_v28  ;;  %v1560_v47 = vmul.f32 -1.442695, %v704_v39  ;;  %p1817_p2 = pnand %p1816_p1, %p1941_p5  ;;  %p1822_p7 = por %p1821_p6, %p1820_p4 }
 0x145   : > { %v1741_v45 = vpop.eup %1740  ;;  %v656_v48 = vadd.f32 %v2531_v56, %v537_v20  ;;  %1378 = vst [vmem:[%s2324_s23 + $0x40] sm:$0xff] %v993_v37  ;;  %v1243_v49 = vsel %vm1242_vm8, %v1735_v12, %v1239_v33  ;;  %vm1001_vm9 = vweird.f32 %v1739_v30  ;;  %v1006_v50 = vand.u32 2147483648, %v2543_v5  ;;  %v709_v54 = vpop.f32.mrf.mxu3 }
 0x146   : > { %v2599_v52 = vadd.f32 1.0, %v1741_v45  ;;  %v1248_v51 = vsel %vm2569_vm4, %v1247_v22, %v1243_v49  ;;  %v998_v57 = vmul.f32 %v1739_v30, %v997_v46  ;;  %1744 = vpow2.f32 %v1560_v47  ;;  %v542_v38 = vpop.f32.mrf.mxu0  ;;  %vm1002_vm10 = vmor %vm1000_vm7, %vm1001_vm9  ;;  %p1818_p3 = pneg %p1817_p2 }
 0x147   : > { %v1544_v58 = vmul.f32 -1.442695, %v656_v48  ;;  %1395 = vst [vmem:[%s2324_s23 + $0xc8] sm:$0xff] %v1248_v51  ;;  %v707_v60 = vadd.f32 %v2554_v3, %v588_v44  ;;  %v659_v61 = vadd.f32 %v658_v34, %v540_v40  ;;  %vm1005_vm11 = vcmp.eq.f32.partialorder %v1004_v42, 8.507059e+37  ;;  %v661_v63 = vpop.f32.mrf.mxu1 }
 0x148   : > { %1746 = vrcp.f32 %v2599_v52  ;;  %v999_v56 = vadd.f32 %v1739_v30, %v998_v57  ;;  %v1007_v62 = vor.u32 1.1754944e-38, %v1006_v50  ;;  %v1259_v55 = vand.u32 2147483647, %v2577_v32  ;;  %p1823_p8 = pnand %p1822_p7, %p1818_p3 }
 0x149   : > { %v1743_v59 = vpop.eup %1742  ;;  %1748 = vpow2.f32 %v1544_v58  ;;  %v1561_v4 = vmul.f32 -1.442695, %v707_v60  ;;  %v1545_v2 = vmul.f32 -1.442695, %v659_v61  ;;  %v591_v6 = vadd.f32 %v2272_v0, %v590_v41 }
 0x14a   : > { %v1251_v53 = vmul.f32 %v1743_v59, %v2577_v32  ;;  %v1003_v1 = vsel %vm1002_vm10, %v1739_v30, %v999_v56  ;;  %v1261_v9 = vand.u32 2147483648, %v2577_v32  ;;  %v543_v5 = vadd.f32 %v2614_v10, %v542_v38 }
 0x14b   : > { %v1008_v7 = vsel %vm1005_vm11, %v1007_v62, %v1003_v1  ;;  %v593_v3 = vpop.f32.mrf.mxu2  ;;  %vm1255_vm12 = vweird.f32 %v2577_v32  ;;  %vm1256_vm13 = vweird.f32 %v1743_v59  ;;  %1750 = vpow2.f32 %v1561_v4 }
 0x14c   : > { %v1252_v8 = vsub.f32 1.0, %v1251_v53  ;;  %v1745_v12 = vpop.eup %1744  ;;  %1379 = vst [vmem:[%s2324_s23 + $0x48] sm:$0xff] %v1008_v7  ;;  %v710_v14 = vadd.f32 %v709_v54, %v591_v6  ;;  %1752 = vpow2.f32 %v1545_v2  ;;  %v662_v16 = vadd.f32 %v661_v63, %v543_v5  ;;  %vm1257_vm15 = vmor %vm1255_vm12, %vm1256_vm13 }
 0x14d   : > { %v2619_v0 = vadd.f32 1.0, %v1745_v12  ;;  %vm2621_vm14 = vcmp.eq.f32.partialorder %v1259_v55, 8.507059e+37  ;;  %v594_v21 = vadd.f32 %v2614_v10, %v593_v3  ;;  %v1262_v24 = vor.u32 1.1754944e-38, %v1261_v9  ;;  %v712_v26 = vpop.f32.mrf.mxu3 }
 0x14e   : > { %v1747_v15 = vpop.eup %1746  ;;  %v1253_v13 = vmul.f32 %v1743_v59, %v1252_v8  ;;  %v1562_v19 = vmul.f32 -1.442695, %v710_v14  ;;  %v1019_v25 = vand.u32 2147483647, %v2599_v52  ;;  %vm1015_vm0 = vweird.f32 %v2599_v52  ;;  %v545_v34 = vpop.f32.mrf.mxu0 }
 0x14f   : > { %v1749_v11 = vpop.eup %1748  ;;  %v1011_v18 = vmul.f32 %v1747_v15, %v2599_v52  ;;  %1754 = vrcp.f32 %v2619_v0  ;;  %vm1016_vm1 = vweird.f32 %v1747_v15  ;;  %v1021_v22 = vand.u32 2147483648, %v2599_v52  ;;  %v664_v48 = vpop.f32.mrf.mxu1 }
 0x150   : > { %v1254_v23 = vadd.f32 %v1743_v59, %v1253_v13  ;;  %v2633_v29 = vadd.f32 1.0, %v1749_v11  ;;  %1756 = vpow2.f32 %v1562_v19  ;;  %v1546_v20 = vmul.f32 -1.442695, %v662_v16  ;;  %vm1017_vm3 = vmor %vm1015_vm0, %vm1016_vm1 }
 0x151   : > { %v1012_v27 = vsub.f32 1.0, %v1011_v18  ;;  %v1751_v30 = vpop.eup %1750  ;;  %v713_v32 = vadd.f32 %v712_v26, %v594_v21  ;;  %vm2640_vm2 = vcmp.eq.f32.partialorder %v1019_v25, 8.507059e+37  ;;  %v1274_v28 = vand.u32 2147483647, %v2619_v0 }
 0x152   : > { %v1258_v31 = vsel %vm1257_vm15, %v1743_v59, %v1254_v23  ;;  %1758 = vrcp.f32 %v2633_v29  ;;  %v1753_v39 = vpop.eup %1752  ;;  %v1276_v42 = vand.u32 2147483648, %v2619_v0  ;;  %v2646_v43 = vadd.f32 1.0, %v1751_v30 }
 0x153   : > { %v1263_v35 = vsel %vm2621_vm14, %v1262_v24, %v1258_v31  ;;  %v1013_v36 = vmul.f32 %v1747_v15, %v1012_v27  ;;  %v2648_v44 = vadd.f32 1.0, %v1753_v39  ;;  %1760 = vpow2.f32 %v1546_v20  ;;  %v2657_v49 = vpop.f32.mrf.mxu2 }
 0x154   : > { %1396 = vst [vmem:[%s2324_s23 + $0xd0] sm:$0xff] %v1263_v35  ;;  %v546_v40 = vadd.f32 %v2614_v10, %v545_v34  ;;  %v1022_v37 = vor.u32 1.1754944e-38, %v1021_v22  ;;  %v1034_v46 = vand.u32 2147483647, %v2633_v29  ;;  %v1036_v47 = vand.u32 2147483648, %v2633_v29 }
 0x155   : > { %v1014_v33 = vadd.f32 %v1747_v15, %v1013_v36  ;;  %v1755_v45 = vpop.eup %1754  ;;  %1762 = vrcp.f32 %v2646_v43  ;;  %vm1270_vm4 = vweird.f32 %v2619_v0  ;;  %v1563_v57 = vmul.f32 -1.442695, %v713_v32  ;;  %v2678_v4 = vpop.f32.mrf.mxu3 }
 0x156   : > { %v1757_v50 = vpop.eup %1756  ;;  %v1266_v51 = vmul.f32 %v1755_v45, %v2619_v0  ;;  %vm2663_vm5 = vcmp.eq.f32.partialorder %v1274_v28, 8.507059e+37  ;;  %v1277_v38 = vor.u32 1.1754944e-38, %v1276_v42  ;;  %1764 = vrcp.f32 %v2648_v44 }
 0x157   : > { %v1018_v54 = vsel %vm1017_vm3, %v1747_v15, %v1014_v33  ;;  %vm1030_vm6 = vweird.f32 %v2633_v29  ;;  %v1289_v60 = vand.u32 2147483647, %v2646_v43  ;;  %v665_v61 = vadd.f32 %v664_v48, %v546_v40  ;;  %v548_v15 = vpop.f32.mrf.mxu0  ;;  %v667_v34 = vpop.f32.mrf.mxu1 }
 0x158   : > { %v1023_v52 = vsel %vm2640_vm2, %v1022_v37, %v1018_v54  ;;  %v1759_v59 = vpop.eup %1758  ;;  %v1267_v56 = vsub.f32 1.0, %v1266_v51  ;;  %vm2672_vm7 = vcmp.eq.f32.partialorder %v1034_v46, 8.507059e+37  ;;  %v1037_v55 = vor.u32 1.1754944e-38, %v1036_v47 }
 0x159   : > { %1380 = vst [vmem:[%s2324_s23 + $0x50] sm:$0xff] %v1023_v52  ;;  %v1026_v62 = vmul.f32 %v1759_v59, %v2633_v29  ;;  %v2676_v1 = vadd.f32 1.0, %v1757_v50  ;;  %v1761_v2 = vpop.eup %1760  ;;  %vm1271_vm8 = vweird.f32 %v1755_v45  ;;  %v1291_v63 = vand.u32 2147483648, %v2646_v43 }
 0x15a   : > { %v1268_v6 = vmul.f32 %v1755_v45, %v1267_v56  ;;  %1766 = vpow2.f32 %v1563_v57  ;;  %vm1285_vm9 = vweird.f32 %v2646_v43  ;;  %vm1045_vm10 = vweird.f32 %v2648_v44  ;;  %vm1272_vm12 = vmor %vm1270_vm4, %vm1271_vm8 }
 0x15b   : > { %v1763_v7 = vpop.eup %1762  ;;  %v1027_v8 = vsub.f32 1.0, %v1026_v62  ;;  %1768 = vrcp.f32 %v2676_v1  ;;  %vm2685_vm11 = vcmp.eq.f32.partialorder %v1289_v60, 8.507059e+37  ;;  %v1049_v12 = vand.u32 2147483647, %v2648_v44  ;;  %v599_v0 = vpop.f32.mrf.mxu2 }
 0x15c   : > { %v1269_v9 = vadd.f32 %v1755_v45, %v1268_v6  ;;  %v1281_v5 = vmul.f32 %v1763_v7, %v2646_v43  ;;  %v1051_v14 = vand.u32 2147483648, %v2648_v44  ;;  %v1765_v13 = vpop.eup %1764  ;;  %vm1031_vm13 = vweird.f32 %v1759_v59 }
 0x15d   : > { %v1028_v16 = vmul.f32 %v1759_v59, %v1027_v8  ;;  %v2694_v11 = vadd.f32 1.0, %v1761_v2  ;;  %v1547_v17 = vmul.f32 -1.442695, %v665_v61  ;;  %v1292_v21 = vor.u32 1.1754944e-38, %v1291_v63  ;;  %vm1032_vm14 = vmor %vm1030_vm6, %vm1031_vm13  ;;  %v718_v33 = vpop.f32.mrf.mxu3 }
 0x15e   : > { %v1273_v18 = vsel %vm1272_vm12, %v1755_v45, %v1269_v9  ;;  %v1282_v19 = vsub.f32 1.0, %v1281_v5  ;;  %v1041_v23 = vmul.f32 %v1765_v13, %v2648_v44  ;;  %v1304_v26 = vand.u32 2147483647, %v2676_v1 }
 0x15f   : > { %v1278_v24 = vsel %vm2663_vm5, %v1277_v38, %v1273_v18  ;;  %v1029_v25 = vadd.f32 %v1759_v59, %v1028_v16  ;;  %1770 = vrcp.f32 %v2694_v11  ;;  %vm1286_vm15 = vweird.f32 %v1763_v7  ;;  %v551_v58 = vpop.f32.mrf.mxu0  ;;  %v670_v5 = vpop.f32.mrf.mxu1 }
 0x160   : > { %v1767_v27 = vpop.eup %1766  ;;  %1397 = vst [vmem:[%s2324_s23 + $0xd8] sm:$0xff] %v1278_v24  ;;  %v1283_v31 = vmul.f32 %v1763_v7, %v1282_v19  ;;  %v1042_v22 = vsub.f32 1.0, %v1041_v23  ;;  %v1306_v20 = vand.u32 2147483648, %v2676_v1  ;;  %vm1046_vm0 = vweird.f32 %v1765_v13  ;;  %vm1287_vm1 = vmor %vm1285_vm9, %vm1286_vm15 }
 0x161   : > { %v1769_v30 = vpop.eup %1768  ;;  %v1033_v35 = vsel %vm1032_vm14, %v1759_v59, %v1029_v25  ;;  %v2705_v36 = vadd.f32 1.0, %v1767_v27  ;;  %1772 = vpow2.f32 %v1547_v17  ;;  %vm2713_vm2 = vcmp.eq.f32.partialorder %v1049_v12, 8.507059e+37  ;;  %vm1047_vm5 = vmor %vm1045_vm10, %vm1046_vm0 }
 0x162   : > { %v1038_v32 = vsel %vm2672_vm7, %v1037_v55, %v1033_v35  ;;  %v1284_v39 = vadd.f32 %v1763_v7, %v1283_v31  ;;  %v1043_v41 = vmul.f32 %v1765_v13, %v1042_v22  ;;  %v1296_v29 = vmul.f32 %v1769_v30, %v2676_v1 }
 0x163   : > { %1381 = vst [vmem:[%s2324_s23 + $0x58] sm:$0xff] %v1038_v32  ;;  %v1052_v42 = vor.u32 1.1754944e-38, %v1051_v14  ;;  %vm1300_vm3 = vweird.f32 %v2676_v1  ;;  %1774 = vrcp.f32 %v2705_v36  ;;  %vm2719_vm4 = vcmp.eq.f32.partialorder %v1304_v26, 8.507059e+37 }
 0x164   : > { %v1288_v40 = vsel %vm1287_vm1, %v1763_v7, %v1284_v39  ;;  %v1044_v45 = vadd.f32 %v1765_v13, %v1043_v41  ;;  %v1297_v37 = vsub.f32 1.0, %v1296_v29  ;;  %v1307_v48 = vor.u32 1.1754944e-38, %v1306_v20  ;;  %v602_v7 = vpop.f32.mrf.mxu2 }
 0x165   : > { %v1771_v43 = vpop.eup %1770  ;;  %v1293_v47 = vsel %vm2685_vm11, %v1292_v21, %v1288_v40  ;;  %v1064_v50 = vand.u32 2147483647, %v2694_v11  ;;  %v597_v54 = vadd.f32 %v2614_v10, %v2657_v49  ;;  %vm1301_vm6 = vweird.f32 %v1769_v30  ;;  %v721_v23 = vpop.f32.mrf.mxu3 }
 0x166   : > { %1398 = vst [vmem:[%s2324_s23 + $0xe0] sm:$0xff] %v1293_v47  ;;  %v1048_v51 = vsel %vm1047_vm5, %v1765_v13, %v1044_v45  ;;  %v1298_v57 = vmul.f32 %v1769_v30, %v1297_v37  ;;  %v1056_v52 = vmul.f32 %v1771_v43, %v2694_v11  ;;  %vm1060_vm7 = vweird.f32 %v2694_v11  ;;  %vm1302_vm8 = vmor %vm1300_vm3, %vm1301_vm6 }
 0x167   : > { %v1773_v38 = vpop.eup %1772  ;;  %v1053_v59 = vsel %vm2713_vm2, %v1052_v42, %v1048_v51  ;;  %v1066_v44 = vand.u32 2147483648, %v2694_v11  ;;  %v549_v56 = vadd.f32 %v2614_v10, %v548_v15  ;;  %v716_v62 = vadd.f32 %v2678_v4, %v597_v54 }
 0x168   : > { %1382 = vst [vmem:[%s2324_s23 + $0x60] sm:$0xff] %v1053_v59  ;;  %v1299_v60 = vadd.f32 %v1769_v30, %v1298_v57  ;;  %v1057_v49 = vsub.f32 1.0, %v1056_v52  ;;  %v2739_v61 = vadd.f32 1.0, %v1773_v38  ;;  %vm2744_vm9 = vcmp.eq.f32.partialorder %v1064_v50, 8.507059e+37 }
 0x169   : > { %v1775_v53 = vpop.eup %1774  ;;  %v668_v2 = vadd.f32 %v667_v34, %v549_v56  ;;  %v600_v6 = vadd.f32 %v2614_v10, %v599_v0  ;;  %v552_v63 = vadd.f32 %v2614_v10, %v551_v58  ;;  %vm1061_vm10 = vweird.f32 %v1771_v43 }
 0x16a   : > { %v1303_v8 = vsel %vm1302_vm8, %v1769_v30, %v1299_v60  ;;  %v1058_v9 = vmul.f32 %v1771_v43, %v1057_v49  ;;  %v1311_v4 = vmul.f32 %v1775_v53, %v2705_v36  ;;  %v1067_v3 = vor.u32 1.1754944e-38, %v1066_v44  ;;  %vm1062_vm11 = vmor %vm1060_vm7, %vm1061_vm10 }
 0x16b   : > { %v1308_v1 = vsel %vm2719_vm4, %v1307_v48, %v1303_v8  ;;  %v1319_v12 = vand.u32 2147483647, %v2705_v36  ;;  %1776 = vrcp.f32 %v2739_v61  ;;  %v1564_v13 = vmul.f32 -1.442695, %v716_v62 }
 0x16c   : > { %1399 = vst [vmem:[%s2324_s23 + $0xe8] sm:$0xff] %v1308_v1  ;;  %v1059_v14 = vadd.f32 %v1771_v43, %v1058_v9  ;;  %v1312_v15 = vsub.f32 1.0, %v1311_v4  ;;  %v603_v16 = vadd.f32 %v2614_v10, %v602_v7  ;;  %v1321_v17 = vand.u32 2147483648, %v2705_v36 }
 0x16d   : > { %v1548_v18 = vmul.f32 -1.442695, %v668_v2  ;;  %v719_v19 = vadd.f32 %v718_v33, %v600_v6  ;;  %v671_v21 = vadd.f32 %v670_v5, %v552_v63  ;;  %vm1316_vm12 = vweird.f32 %v1775_v53 }
 0x16e   : > { %v1063_v24 = vsel %vm1062_vm11, %v1771_v43, %v1059_v14  ;;  %v1313_v25 = vmul.f32 %v1775_v53, %v1312_v15  ;;  %1778 = vpow2.f32 %v1564_v13  ;;  %vm1315_vm13 = vweird.f32 %v2705_v36 }
 0x16f   : > { %v1068_v26 = vsel %vm2744_vm9, %v1067_v3, %v1063_v24  ;;  %1780 = vpow2.f32 %v1548_v18  ;;  %v1565_v0 = vmul.f32 -1.442695, %v719_v19  ;;  %v1549_v27 = vmul.f32 -1.442695, %v671_v21  ;;  %vm1317_vm14 = vmor %vm1315_vm13, %vm1316_vm12 }
 0x170   : > { %1383 = vst [vmem:[%s2324_s23 + $0x68] sm:$0xff] %v1068_v26  ;;  %v1314_v10 = vadd.f32 %v1775_v53, %v1313_v25  ;;  %v722_v11 = vadd.f32 %v721_v23, %v603_v16  ;;  %v1322_v22 = vor.u32 1.1754944e-38, %v1321_v17  ;;  %vm1320_vm15 = vcmp.eq.f32.partialorder %v1319_v12, 8.507059e+37 }
 0x171   : > { %v1777_v31 = vpop.eup %1776  ;;  %1782 = vpow2.f32 %v1565_v0  ;;  %vm1075_vm0 = vweird.f32 %v2739_v61  ;;  %v1081_v36 = vand.u32 2147483648, %v2739_v61  ;;  %v1079_v42 = vand.u32 2147483647, %v2739_v61 }
 0x172   : > { %v1318_v20 = vsel %vm1317_vm14, %v1775_v53, %v1314_v10  ;;  %v1071_v34 = vmul.f32 %v1777_v31, %v2739_v61  ;;  %1784 = vpow2.f32 %v1549_v27  ;;  %v1566_v35 = vmul.f32 -1.442695, %v722_v11 }
 0x173   : > { %v1323_v30 = vsel %vm1320_vm15, %v1322_v22, %v1318_v20  ;;  %vm1076_vm1 = vweird.f32 %v1777_v31  ;;  %v1082_v46 = vor.u32 1.1754944e-38, %v1081_v36  ;;  %vm1080_vm3 = vcmp.eq.f32.partialorder %v1079_v42, 8.507059e+37 }
 0x174   : > { %v1779_v32 = vpop.eup %1778  ;;  %1400 = vst [vmem:[%s2324_s23 + $0xf0] sm:$0xff] %v1323_v30  ;;  %v1072_v39 = vsub.f32 1.0, %v1071_v34  ;;  %1786 = vpow2.f32 %v1566_v35  ;;  %vm1077_vm2 = vmor %vm1075_vm0, %vm1076_vm1 }
 0x175   : > { %v1781_v41 = vpop.eup %1780  ;;  %v857_v29 = vadd.f32 1.0, %v1779_v32 }
 0x176   : > { %v1073_v28 = vmul.f32 %v1777_v31, %v1072_v39  ;;  %v841_v33 = vadd.f32 1.0, %v1781_v41 }
 0x177   : > { %v1783_v40 = vpop.eup %1782  ;;  %1788 = vrcp.f32 %v857_v29  ;;  %v1334_v57 = vand.u32 2147483647, %v857_v29  ;;  %v1336_v52 = vand.u32 2147483648, %v857_v29  ;;  %vm1330_vm4 = vweird.f32 %v857_v29 }
 0x178   : > { %v1785_v45 = vpop.eup %1784  ;;  %v1074_v37 = vadd.f32 %v1777_v31, %v1073_v28  ;;  %1790 = vrcp.f32 %v841_v33  ;;  %v2769_v43 = vadd.f32 1.0, %v1783_v40  ;;  %v1094_v58 = vand.u32 2147483647, %v841_v33 }
 0x179   : > { %v2771_v48 = vadd.f32 1.0, %v1785_v45  ;;  %v1096_v56 = vand.u32 2147483648, %v841_v33  ;;  %vm1090_vm5 = vweird.f32 %v841_v33  ;;  %vm2779_vm6 = vcmp.eq.f32.partialorder %v1334_v57, 8.507059e+37 }
 0x17a   : > { %v1078_v47 = vsel %vm1077_vm2, %v1777_v31, %v1074_v37  ;;  %v1787_v50 = vpop.eup %1786  ;;  %1792 = vrcp.f32 %v2769_v43  ;;  %v1337_v53 = vor.u32 1.1754944e-38, %v1336_v52  ;;  %vm2783_vm7 = vcmp.eq.f32.partialorder %v1094_v58, 8.507059e+37 }
 0x17b   : > { %v1083_v54 = vsel %vm1080_vm3, %v1082_v46, %v1078_v47  ;;  %1794 = vrcp.f32 %v2771_v48  ;;  %v2776_v38 = vadd.f32 1.0, %v1787_v50  ;;  %v1097_v7 = vor.u32 1.1754944e-38, %v1096_v56 }
 0x17c   : > { %1384 = vst [vmem:[%s2324_s23 + $0x70] sm:$0xff] %v1083_v54  ;;  %v1349_v4 = vand.u32 2147483647, %v2769_v43  ;;  %v1351_v12 = vand.u32 2147483648, %v2769_v43  ;;  %vm1105_vm10 = vweird.f32 %v2771_v48  ;;  %v1109_v13 = vand.u32 2147483647, %v2771_v48 }
 0x17d   : > { %v1789_v51 = vpop.eup %1788  ;;  %1796 = vrcp.f32 %v2776_v38  ;;  %v1111_v16 = vand.u32 2147483648, %v2771_v48  ;;  %vm1345_vm15 = vweird.f32 %v2769_v43  ;;  %v1364_v20 = vand.u32 2147483647, %v2776_v38 }
 0x17e   : > { %v1791_v59 = vpop.eup %1790  ;;  %v1326_v44 = vmul.f32 %v1789_v51, %v857_v29  ;;  %vm1331_vm8 = vweird.f32 %v1789_v51  ;;  %vm1350_vm0 = vcmp.eq.f32.partialorder %v1349_v4, 8.507059e+37  ;;  %v1352_v27 = vor.u32 1.1754944e-38, %v1351_v12 }
 0x17f   : > { %v1086_v60 = vmul.f32 %v1791_v59, %v841_v33  ;;  %vm1091_vm9 = vweird.f32 %v1791_v59  ;;  %vm1332_vm11 = vmor %vm1330_vm4, %vm1331_vm8  ;;  %vm1110_vm2 = vcmp.eq.f32.partialorder %v1109_v13, 8.507059e+37  ;;  %v1112_v22 = vor.u32 1.1754944e-38, %v1111_v16 }
 0x180   : > { %v1327_v49 = vsub.f32 1.0, %v1326_v44  ;;  %v1793_v61 = vpop.eup %1792  ;;  %vm1092_vm12 = vmor %vm1090_vm5, %vm1091_vm9  ;;  %v1366_v34 = vand.u32 2147483648, %v2776_v38  ;;  %vm1360_vm5 = vweird.f32 %v2776_v38 }
 0x181   : > { %v1087_v55 = vsub.f32 1.0, %v1086_v60  ;;  %v1795_v6 = vpop.eup %1794  ;;  %v1341_v8 = vmul.f32 %v1793_v61, %v2769_v43  ;;  %vm1346_vm13 = vweird.f32 %v1793_v61 }
 0x182   : > { %v1328_v63 = vmul.f32 %v1789_v51, %v1327_v49  ;;  %v1101_v5 = vmul.f32 %v1795_v6, %v2771_v48  ;;  %vm1106_vm14 = vweird.f32 %v1795_v6  ;;  %vm1347_vm1 = vmor %vm1345_vm15, %vm1346_vm13  ;;  %v1367_v36 = vor.u32 1.1754944e-38, %v1366_v34 }
 0x183   : > { %v1088_v9 = vmul.f32 %v1791_v59, %v1087_v55  ;;  %v1342_v3 = vsub.f32 1.0, %v1341_v8  ;;  %v1797_v17 = vpop.eup %1796  ;;  %vm1107_vm3 = vmor %vm1105_vm10, %vm1106_vm14 }
 0x184   : > { %v1329_v1 = vadd.f32 %v1789_v51, %v1328_v63  ;;  %v1102_v15 = vsub.f32 1.0, %v1101_v5  ;;  %v1356_v25 = vmul.f32 %v1797_v17, %v2776_v38  ;;  %vm1361_vm4 = vweird.f32 %v1797_v17 }
 0x185   : > { %v1089_v14 = vadd.f32 %v1791_v59, %v1088_v9  ;;  %v1343_v19 = vmul.f32 %v1793_v61, %v1342_v3 }
 0x186   : > { %v1333_v18 = vsel %vm1332_vm11, %v1789_v51, %v1329_v1  ;;  %v1103_v24 = vmul.f32 %v1795_v6, %v1102_v15  ;;  %v1357_v11 = vsub.f32 1.0, %v1356_v25 }
 0x187   : > { %v1338_v21 = vsel %vm2779_vm6, %v1337_v53, %v1333_v18  ;;  %v1093_v23 = vsel %vm1092_vm12, %v1791_v59, %v1089_v14  ;;  %v1344_v0 = vadd.f32 %v1793_v61, %v1343_v19  ;;  %vm1362_vm6 = vmor %vm1360_vm5, %vm1361_vm4 }
 0x188   : > { %1401 = vst [vmem:[%s2324_s23 + $0xf8] sm:$0xff] %v1338_v21  ;;  %v1098_v26 = vsel %vm2783_vm7, %v1097_v7, %v1093_v23  ;;  %v1104_v10 = vadd.f32 %v1795_v6, %v1103_v24  ;;  %v1358_v32 = vmul.f32 %v1797_v17, %v1357_v11  ;;  %vm1365_vm7 = vcmp.eq.f32.partialorder %v1364_v20, 8.507059e+37 }
 0x189   : > { %1385 = vst [vmem:[%s2324_s23 + $0x78] sm:$0xff] %v1098_v26  ;;  %v1348_v31 = vsel %vm1347_vm1, %v1793_v61, %v1344_v0 }
 0x18a   : > { %v1353_v30 = vsel %vm1350_vm0, %v1352_v27, %v1348_v31  ;;  %v1108_v35 = vsel %vm1107_vm3, %v1795_v6, %v1104_v10  ;;  %v1359_v41 = vadd.f32 %v1797_v17, %v1358_v32 }
 0x18b   : > { %1402 = vst [vmem:[%s2324_s23 + $0x100] sm:$0xff] %v1353_v30  ;;  %v1113_v39 = vsel %vm1110_vm2, %v1112_v22, %v1108_v35 }
 0x18c   : > { %1386 = vst [vmem:[%s2324_s23 + $0x80] sm:$0xff] %v1113_v39  ;;  %v1363_v29 = vsel %vm1362_vm6, %v1797_v17, %v1359_v41 }
 0x18d   : > { %v1368_v28 = vsel %vm1365_vm7, %v1367_v36, %v1363_v29 }
 0x18e   : > { %1403 = vst [vmem:[%s2324_s23 + $0x108] sm:$0xff] %v1368_v28 }
 0x18f   : > { %1826 = shalt.err (!%p1823_p8)
}
 0x190   : > { %s1879_s6 = smov 128   ;;  %s1880_s19 = smov 256  }
 0x191   : > { %s1881_s21 = smov 8  }
 0x192   : > { %1603 = dma.vmem_to_hbm [thread:$0]  (%p1941_p5), %s1420_s28, 4352, %s1422_s29, %s1405_s30, %s1879_s6, %s1880_s19, %s1881_s21  }
 0x193 PF: > { %s1436_s23 = sand.u32 1, %s1857_s12   ;;  %p1606_p11 = pnand %p1528_p10, %p1952_p9 }
 0x194   : > { %s1437_s18 = scalar_lea.sflag [#allocation4], %s1436_s23 }
 0x195   : > { %p1607_p12 = pneg %p1606_p11 }
 0x197   : > { %1852 = dma.done.wait (%p1607_p12), %s1437_s18, 4352  }
 0x198   : > { %1854 = vsyncadd (%p1607_p12), %s1437_s18, 4294962944  ;;  %s16_s17 = sadd.s32 1, %s1877_s17   ;;  %s2907_s12 = smov %s1861_s13 }
 0x199   : > { %p13_p13 = scmp.ge.s32.totalorder %s16_s17, 4   ;;  %s2908_s13 = smov %s1865_s14 }
 0x19a   : > { %s2909_s14 = smov %s1950_s24  ;;  %s2910_s15 = smov %s1873_s16 }
 0x19b   : > { %s2911_s16 = smov %s2913_s20  ;;  %15 = sbr.rel (!%p13_p13) target bundleno = 4 (0x4), region = 116 }
 0x1a0   :  { %1443 = vsyncpa [#allocation4], 1 }
 0x1a1   :  { %1445 = vsyncpa [#allocation4 + $0x1], 1 }

</bundles_post_ra>
